<compile_context>
chip_gen: v5e
topology: v5e:2x2
jax: 0.10.0
libtpu: 0.0.40
codegen_flags: <defaults>
</compile_context>

<pallas_src>
import numpy as np

import jax
import jax.numpy as jnp
from jax.experimental import pallas as pl
from jax.experimental.pallas import tpu as pltpu

# Static LeNet5 geometry (28x28 input, as implied by fc1 = 16*4*4).
KS = 5            # conv kernel size
S_IN = 28         # input spatial size
S_C1 = 24         # conv1 output spatial size
S_P1 = 12         # pool1 output spatial size
S_C2 = 8          # conv2 output spatial size
S_P2 = 4          # pool2 output spatial size
C1 = 6            # conv1 out channels
C2 = 16           # conv2 out channels
F1, F2, N_CLS = 120, 84, 10
N_PAD = 128       # lane-dense logits width (cols 10..127 are zero)

BF16 = jnp.bfloat16


# ---------------------------------------------------------------------------
# The fused kernel.  Activation layouts (per batch-block of `nb` images):
#   x  : (nb*28, 28)    rows (n, h),  cols w
#   z1 : (nb*28, 144)   rows (n, oh), cols (ow, c)   [rows oh>=24 are garbage]
#   p1 : (nb*12, 72)
#   z2 : (nb*12, 128)                                [rows oh>=8  are garbage]
#   p2 : (nb*4,  64)
#   fc : (nb*4, 120) -> (nb, 120) -> (nb, 84) -> (nb, 128)
# ---------------------------------------------------------------------------
def _lenet5_kernel(x_ref, w1t_ref, ball_ref, p1r_ref, c1s_ref,
                   w2t_ref, p2r_ref, c2s_ref,
                   fw1_ref, fw2_ref, fw3_ref, fcsel_ref, out_ref):

    def mm(a, b):
        return jnp.dot(a, b, preferred_element_type=jnp.float32)

    def shift_rows(a, k):
        # Row r of the result = row (r + k) of `a` (static k >= 0; XLU roll).
        if k == 0:
            return a
        return pltpu.roll(a, a.shape[0] - k, axis=0)

    def pool2x2(z, row_sel, col_sel_ref):
        # Rows: adjacent-pair max via roll (XLU/VPU) + ONE one-hot downselect.
        # Cols: small batch-independent even/odd one-hot selects + max.
        zr = jnp.maximum(z, shift_rows(z, 1))
        t = mm(row_sel, zr.astype(BF16)).astype(BF16)       # exact (one-hot)
        return jnp.maximum(mm(t, col_sel_ref[0]), mm(t, col_sel_ref[1]))

    biases = ball_ref[...]                                   # (8, 144) f32
    x = x_ref[...]                                           # (nb*28, 28) f32

    # conv1 + bias + ReLU: sum over the 5 kernel rows, ki shift via roll.
    acc = mm(x.astype(BF16), w1t_ref[0])
    for ki in range(1, KS):
        acc = acc + mm(shift_rows(x, ki).astype(BF16), w1t_ref[ki])
    z1 = jnp.maximum(acc + biases[0:1, :S_C1 * C1], 0.0)     # (nb*28, 144)

    p1 = pool2x2(z1, p1r_ref[...], c1s_ref)                  # (nb*12, 72) f32

    # conv2 + bias + ReLU.
    acc = mm(p1.astype(BF16), w2t_ref[0])
    for ki in range(1, KS):
        acc = acc + mm(shift_rows(p1, ki).astype(BF16), w2t_ref[ki])
    z2 = jnp.maximum(acc + biases[1:2, :S_C2 * C2], 0.0)     # (nb*12, 128)

    p2 = pool2x2(z2, p2r_ref[...], c2s_ref)                  # (nb*4, 64) f32

    # flatten (torch NCHW order folded into fw1 packing) + fc1 + ReLU.  The
    # per-image sum over the 4 pooled rows is done with rolls; image n's
    # result lands in row n*4 and is picked afterwards by `fcsel`.
    acc = mm(p2.astype(BF16), fw1_ref[0])
    for h in range(1, S_P2):
        acc = acc + mm(shift_rows(p2, h).astype(BF16), fw1_ref[h])
    a1 = jnp.maximum(acc + biases[2:3, :F1], 0.0)            # (nb*4, 120)
    a1 = mm(fcsel_ref[...], a1.astype(BF16)).astype(BF16)    # (nb, 120)

    a2 = jnp.maximum(mm(a1, fw2_ref[...]) + biases[3:4, :F2], 0.0)    # (nb, 84)
    logits = mm(a2.astype(BF16), fw3_ref[...]) + biases[4:5, :N_PAD]  # (nb,128)
    out_ref[...] = logits.astype(out_ref.dtype)


# ---------------------------------------------------------------------------
# One-time packing of PyTorch-layout weights into kernel operands
# (bf16 Toeplitz conv slabs, one-hot selectors, padded fc weights, one
#  f32 bias slab).  Pure host-side numpy.
# ---------------------------------------------------------------------------
def _prepare_operands(params, nb):
    f32 = np.float32
    w1 = np.asarray(params["w1"], f32)    # (6, 1, 5, 5)   OIHW
    b1 = np.asarray(params["b1"], f32)
    w2 = np.asarray(params["w2"], f32)    # (16, 6, 5, 5)
    b2 = np.asarray(params["b2"], f32)
    fw1 = np.asarray(params["fw1"], f32)  # (120, 256)     torch Linear [out, in]
    fb1 = np.asarray(params["fb1"], f32)
    fw2 = np.asarray(params["fw2"], f32)  # (84, 120)
    fb2 = np.asarray(params["fb2"], f32)
    fw3 = np.asarray(params["fw3"], f32)  # (10, 84)
    fb3 = np.asarray(params["fb3"], f32)

    # conv1 Toeplitz slabs: w1t[ki, ow+kj, ow*6+co] = w1[co, 0, ki, kj].
    w1t = np.zeros((KS, S_IN, S_C1 * C1), f32)
    for ki in range(KS):
        for kj in range(KS):
            for ow in range(S_C1):
                w1t[ki, ow + kj, ow * C1:(ow + 1) * C1] = w1[:, 0, ki, kj]

    # conv2 Toeplitz slabs: w2t[ki, (ow+kj)*6+ci, ow*16+co] = w2[co,ci,ki,kj].
    w2t = np.zeros((KS, S_P1 * C1, S_C2 * C2), f32)
    for ki in range(KS):
        for kj in range(KS):
            for ow in range(S_C2):
                w2t[ki, (ow + kj) * C1:(ow + kj + 1) * C1,
                    ow * C2:(ow + 1) * C2] = w2[:, :, ki, kj].T

    # All biases packed into one (8, 144) f32 slab (one DMA instead of five).
    b_all = np.zeros((8, S_C1 * C1), f32)
    b_all[0, :S_C1 * C1] = np.tile(b1, S_C1)
    b_all[1, :S_C2 * C2] = np.tile(b2, S_C2)
    b_all[2, :F1] = fb1
    b_all[3, :F2] = fb2
    b_all[4, :N_CLS] = fb3

    # pool1: one-hot row downselect (rows n*28 + 2*ph of the row-pair max)
    # and even/odd column selectors over the (ow, channel) column layout.
    p1r = np.zeros((nb * S_P1, nb * S_IN), f32)
    for n in range(nb):
        for ph in range(S_P1):
            p1r[n * S_P1 + ph, n * S_IN + 2 * ph] = 1.0
    c1s = np.zeros((2, S_C1 * C1, S_P1 * C1), f32)
    for dw in range(2):
        for pw in range(S_P1):
            for c in range(C1):
                c1s[dw, (2 * pw + dw) * C1 + c, pw * C1 + c] = 1.0

    # pool2 selectors.
    p2r = np.zeros((nb * S_P2, nb * S_P1), f32)
    for n in range(nb):
        for ph in range(S_P2):
            p2r[n * S_P2 + ph, n * S_P1 + 2 * ph] = 1.0
    c2s = np.zeros((2, S_C2 * C2, S_P2 * C2), f32)
    for dw in range(2):
        for pw in range(S_P2):
            for c in range(C2):
                c2s[dw, (2 * pw + dw) * C2 + c, pw * C2 + c] = 1.0

    # fc1 weights reordered so p2's (w*16 + c) column layout hits the torch
    # flatten index (c*16 + h*4 + w); one slab per pooled row h.
    fw1k = np.zeros((S_P2, S_P2 * C2, F1), f32)
    for h in range(S_P2):
        for w in range(S_P2):
            for c in range(C2):
                fw1k[h, w * C2 + c, :] = fw1[:, c * (S_P2 * S_P2) + h * S_P2 + w]

    # Final row selector: picks row n*4 (image n's fc1 result) after the ReLU.
    fcsel = np.zeros((nb, nb * S_P2), f32)
    for n in range(nb):
        fcsel[n, n * S_P2] = 1.0

    fw2k = np.ascontiguousarray(fw2.T)                       # (120, 84)
    fw3k = np.zeros((F2, N_PAD), f32)                        # lane-dense logits
    fw3k[:, :N_CLS] = fw3.T

    bf = lambda a: jnp.asarray(a, BF16)
    return [bf(w1t), jnp.asarray(b_all), bf(p1r), bf(c1s), bf(w2t), bf(p2r),
            bf(c2s), bf(fw1k), bf(fw2k), bf(fw3k), bf(fcsel)]


def _replicated_spec(shape):
    nd = len(shape)
    return pl.BlockSpec(tuple(int(s) for s in shape),
                        lambda i, _nd=nd: (0,) * _nd)


def _choose_blocking(batch):
    """Pick (batch_block nb, padded_batch).  nb is even (keeps every in-kernel
    slab's sublane count a multiple of 8) and either nb % 8 == 0 or the grid
    has a single step, so every BlockSpec obeys the (8, 128) rule."""
    for nb in (32, 16, 8):
        if batch % nb == 0:
            return nb, batch
    if batch <= 32:
        nb = batch + (batch % 2)          # pad odd small batches to even
        return nb, nb
    padded = ((batch + 31) // 32) * 32    # pad irregular large batches
    return 32, padded


def build_lenet5_forward(params, batch):
    nb, padded_batch = _choose_blocking(batch)
    grid = (padded_batch // nb,)
    assert padded_batch % nb == 0 and nb % 2 == 0
    assert grid[0] == 1 or nb % 8 == 0    # (8,128) rule for the (nb,128) block
    consts = _prepare_operands(params, nb)

    in_specs = [pl.BlockSpec((nb * S_IN, S_IN), lambda i: (i, 0))]
    in_specs += [_replicated_spec(c.shape) for c in consts]
    out_spec = pl.BlockSpec((nb, N_PAD), lambda i: (i, 0))

    fused = pl.pallas_call(
        _lenet5_kernel,
        out_shape=jax.ShapeDtypeStruct((padded_batch, N_PAD), jnp.float32),
        grid=grid,
        in_specs=in_specs,
        out_specs=out_spec,
        compiler_params=pltpu.CompilerParams(
            dimension_semantics=("parallel",),
            vmem_limit_bytes=48 * 1024 * 1024),
    )

    @jax.jit
    def forward(x_nchw):
        # (N, 1, 28, 28) -> (padded_N*28, 28); row index = (image, image_row).
        xf = x_nchw.astype(jnp.float32).reshape(batch, S_IN * S_IN)
        if padded_batch != batch:
            xf = jnp.pad(xf, ((0, padded_batch - batch), (0, 0)))
        x2d = xf.reshape(padded_batch * S_IN, S_IN)
        out = fused(x2d, *consts)
        return out[:batch, :N_CLS]

    return forward


# ---------------------------------------------------------------------------
# PyTorch-layout parameter init + pure-JAX reference (for validation only).
# ---------------------------------------------------------------------------
def init_params(key):
    ks = jax.random.split(key, 10)

    def u(k, shape, fan_in):
        b = 1.0 / float(np.sqrt(fan_in))
        return jax.random.uniform(k, shape, jnp.float32, -b, b)

    return {
        "w1": u(ks[0], (C1, 1, KS, KS), 25),     "b1": u(ks[1], (C1,), 25),
        "w2": u(ks[2], (C2, C1, KS, KS), 150),   "b2": u(ks[3], (C2,), 150),
        "fw1": u(ks[4], (F1, C2 * S_P2 * S_P2), 256), "fb1": u(ks[5], (F1,), 256),
        "fw2": u(ks[6], (F2, F1), 120),          "fb2": u(ks[7], (F2,), 120),
        "fw3": u(ks[8], (N_CLS, F2), 84),        "fb3": u(ks[9], (N_CLS,), 84),
    }


def _pool_ref(y):
    n, c, h, w = y.shape
    return y.reshape(n, c, h // 2, 2, w // 2, 2).max(axis=(3, 5))


def lenet5_reference(params, x_nchw):
    dn = ("NCHW", "OIHW", "NCHW")
    y = jax.lax.conv_general_dilated(
        x_nchw.astype(jnp.float32), params["w1"], (1, 1), "VALID",
        dimension_numbers=dn)
    y = _pool_ref(jax.nn.relu(y + params["b1"][None, :, None, None]))
    y = jax.lax.conv_general_dilated(
        y, params["w2"], (1, 1), "VALID", dimension_numbers=dn)
    y = _pool_ref(jax.nn.relu(y + params["b2"][None, :, None, None]))
    y = y.reshape(y.shape[0], -1)                       # torch.flatten(x, 1)
    y = jax.nn.relu(y @ params["fw1"].T + params["fb1"])
    y = jax.nn.relu(y @ params["fw2"].T + params["fb2"])
    return y @ params["fw3"].T + params["fb3"]


if __name__ == "__main__":
    key = jax.random.PRNGKey(0)
    pkey, xkey = jax.random.split(key)
    params = init_params(pkey)

    batch = 2
    x = jax.random.normal(xkey, (batch, 1, S_IN, S_IN), jnp.float32)

    forward = build_lenet5_forward(params, batch)
    out = jax.block_until_ready(forward(x))
    assert out.shape == (batch, N_CLS)

    ref = jax.block_until_ready(lenet5_reference(params, x))
    err = float(jnp.max(jnp.abs(out - ref)))
    # bf16 operands with f32 accumulation: rounding stays well under 3e-2.
    assert err < 3e-2, f"kernel/reference mismatch: max abs err {err}"

    print("KERNEL_OK")
</pallas_src>

<mosaic_0001>
module attributes {stable_mosaic.version = 11 : i64} {
  func.func @_lenet5_kernel(%arg0: i32, %arg1: memref<56x28xf32, #tpu.memory_space<vmem>>, %arg2: memref<5x28x144xbf16, #tpu.memory_space<vmem>>, %arg3: memref<8x144xf32, #tpu.memory_space<vmem>>, %arg4: memref<24x56xbf16, #tpu.memory_space<vmem>>, %arg5: memref<2x144x72xbf16, #tpu.memory_space<vmem>>, %arg6: memref<5x72x128xbf16, #tpu.memory_space<vmem>>, %arg7: memref<8x24xbf16, #tpu.memory_space<vmem>>, %arg8: memref<2x128x64xbf16, #tpu.memory_space<vmem>>, %arg9: memref<4x64x120xbf16, #tpu.memory_space<vmem>>, %arg10: memref<120x84xbf16, #tpu.memory_space<vmem>>, %arg11: memref<84x128xbf16, #tpu.memory_space<vmem>>, %arg12: memref<2x8xbf16, #tpu.memory_space<vmem>>, %arg13: memref<2x128xf32, #tpu.memory_space<vmem>>) attributes {dimension_semantics = [#tpu.dimension_semantics<parallel>], iteration_bounds = array<i64: 1>, scalar_prefetch = 0 : i64, scratch_operands = 0 : i64, tpu.core_type = #tpu.core_type<tc>, window_params = [{transform_indices = @transform_0, window_bounds = array<i64: 56, 28>}, {pipeline_mode = #tpu.pipeline_mode<synchronous>, transform_indices = @transform_1, window_bounds = array<i64: 5, 28, 144>}, {pipeline_mode = #tpu.pipeline_mode<synchronous>, transform_indices = @transform_2, window_bounds = array<i64: 8, 144>}, {pipeline_mode = #tpu.pipeline_mode<synchronous>, transform_indices = @transform_3, window_bounds = array<i64: 24, 56>}, {pipeline_mode = #tpu.pipeline_mode<synchronous>, transform_indices = @transform_4, window_bounds = array<i64: 2, 144, 72>}, {pipeline_mode = #tpu.pipeline_mode<synchronous>, transform_indices = @transform_5, window_bounds = array<i64: 5, 72, 128>}, {pipeline_mode = #tpu.pipeline_mode<synchronous>, transform_indices = @transform_6, window_bounds = array<i64: 8, 24>}, {pipeline_mode = #tpu.pipeline_mode<synchronous>, transform_indices = @transform_7, window_bounds = array<i64: 2, 128, 64>}, {pipeline_mode = #tpu.pipeline_mode<synchronous>, transform_indices = @transform_8, window_bounds = array<i64: 4, 64, 120>}, {pipeline_mode = #tpu.pipeline_mode<synchronous>, transform_indices = @transform_9, window_bounds = array<i64: 120, 84>}, {pipeline_mode = #tpu.pipeline_mode<synchronous>, transform_indices = @transform_10, window_bounds = array<i64: 84, 128>}, {pipeline_mode = #tpu.pipeline_mode<synchronous>, transform_indices = @transform_11, window_bounds = array<i64: 2, 8>}, {transform_indices = @transform_12, window_bounds = array<i64: 2, 128>}]} {
    %c0 = arith.constant 0 : index
    %c0_0 = arith.constant 0 : index
    %0 = vector.load %arg3[%c0, %c0_0] : memref<8x144xf32, #tpu.memory_space<vmem>>, vector<8x144xf32>
    %c0_1 = arith.constant 0 : index
    %c0_2 = arith.constant 0 : index
    %1 = vector.load %arg1[%c0_1, %c0_2] : memref<56x28xf32, #tpu.memory_space<vmem>>, vector<56x28xf32>
    %2 = arith.truncf %1 : vector<56x28xf32> to vector<56x28xbf16>
    %c0_3 = arith.constant 0 : index
    %c0_4 = arith.constant 0 : index
    %c0_5 = arith.constant 0 : index
    %3 = vector.load %arg2[%c0_3, %c0_4, %c0_5] : memref<5x28x144xbf16, #tpu.memory_space<vmem>>, vector<1x28x144xbf16>
    %4 = vector.shape_cast %3 : vector<1x28x144xbf16> to vector<28x144xbf16>
    %cst = arith.constant dense<0.000000e+00> : vector<56x144xf32>
    %5 = tpu.matmul %2, %4, %cst {dimension_numbers = #tpu.dot_dimension_numbers<[1], [0], [0], [1], [0, 0, 1, 1], [], []>} : vector<56x28xbf16>, vector<28x144xbf16>, vector<56x144xf32> -> vector<56x144xf32>
    %c55_i32 = arith.constant 55 : i32
    %6 = tpu.dynamic_rotate %1 by %c55_i32 dim 0 : vector<56x28xf32>, i32 -> vector<56x28xf32>
    %7 = arith.truncf %6 : vector<56x28xf32> to vector<56x28xbf16>
    %c1 = arith.constant 1 : index
    %c0_6 = arith.constant 0 : index
    %c0_7 = arith.constant 0 : index
    %8 = vector.load %arg2[%c1, %c0_6, %c0_7] : memref<5x28x144xbf16, #tpu.memory_space<vmem>>, vector<1x28x144xbf16>
    %9 = vector.shape_cast %8 : vector<1x28x144xbf16> to vector<28x144xbf16>
    %cst_8 = arith.constant dense<0.000000e+00> : vector<56x144xf32>
    %10 = tpu.matmul %7, %9, %cst_8 {dimension_numbers = #tpu.dot_dimension_numbers<[1], [0], [0], [1], [0, 0, 1, 1], [], []>} : vector<56x28xbf16>, vector<28x144xbf16>, vector<56x144xf32> -> vector<56x144xf32>
    %11 = arith.addf %5, %10 : vector<56x144xf32>
    %c54_i32 = arith.constant 54 : i32
    %12 = tpu.dynamic_rotate %1 by %c54_i32 dim 0 : vector<56x28xf32>, i32 -> vector<56x28xf32>
    %13 = arith.truncf %12 : vector<56x28xf32> to vector<56x28xbf16>
    %c2 = arith.constant 2 : index
    %c0_9 = arith.constant 0 : index
    %c0_10 = arith.constant 0 : index
    %14 = vector.load %arg2[%c2, %c0_9, %c0_10] : memref<5x28x144xbf16, #tpu.memory_space<vmem>>, vector<1x28x144xbf16>
    %15 = vector.shape_cast %14 : vector<1x28x144xbf16> to vector<28x144xbf16>
    %cst_11 = arith.constant dense<0.000000e+00> : vector<56x144xf32>
    %16 = tpu.matmul %13, %15, %cst_11 {dimension_numbers = #tpu.dot_dimension_numbers<[1], [0], [0], [1], [0, 0, 1, 1], [], []>} : vector<56x28xbf16>, vector<28x144xbf16>, vector<56x144xf32> -> vector<56x144xf32>
    %17 = arith.addf %11, %16 : vector<56x144xf32>
    %c53_i32 = arith.constant 53 : i32
    %18 = tpu.dynamic_rotate %1 by %c53_i32 dim 0 : vector<56x28xf32>, i32 -> vector<56x28xf32>
    %19 = arith.truncf %18 : vector<56x28xf32> to vector<56x28xbf16>
    %c3 = arith.constant 3 : index
    %c0_12 = arith.constant 0 : index
    %c0_13 = arith.constant 0 : index
    %20 = vector.load %arg2[%c3, %c0_12, %c0_13] : memref<5x28x144xbf16, #tpu.memory_space<vmem>>, vector<1x28x144xbf16>
    %21 = vector.shape_cast %20 : vector<1x28x144xbf16> to vector<28x144xbf16>
    %cst_14 = arith.constant dense<0.000000e+00> : vector<56x144xf32>
    %22 = tpu.matmul %19, %21, %cst_14 {dimension_numbers = #tpu.dot_dimension_numbers<[1], [0], [0], [1], [0, 0, 1, 1], [], []>} : vector<56x28xbf16>, vector<28x144xbf16>, vector<56x144xf32> -> vector<56x144xf32>
    %23 = arith.addf %17, %22 : vector<56x144xf32>
    %c52_i32 = arith.constant 52 : i32
    %24 = tpu.dynamic_rotate %1 by %c52_i32 dim 0 : vector<56x28xf32>, i32 -> vector<56x28xf32>
    %25 = arith.truncf %24 : vector<56x28xf32> to vector<56x28xbf16>
    %c4 = arith.constant 4 : index
    %c0_15 = arith.constant 0 : index
    %c0_16 = arith.constant 0 : index
    %26 = vector.load %arg2[%c4, %c0_15, %c0_16] : memref<5x28x144xbf16, #tpu.memory_space<vmem>>, vector<1x28x144xbf16>
    %27 = vector.shape_cast %26 : vector<1x28x144xbf16> to vector<28x144xbf16>
    %cst_17 = arith.constant dense<0.000000e+00> : vector<56x144xf32>
    %28 = tpu.matmul %25, %27, %cst_17 {dimension_numbers = #tpu.dot_dimension_numbers<[1], [0], [0], [1], [0, 0, 1, 1], [], []>} : vector<56x28xbf16>, vector<28x144xbf16>, vector<56x144xf32> -> vector<56x144xf32>
    %29 = arith.addf %23, %28 : vector<56x144xf32>
    %30 = vector.extract_strided_slice %0 {offsets = [0, 0], sizes = [1, 144], strides = [1, 1]} : vector<8x144xf32> to vector<1x144xf32>
    %31 = vector.broadcast %30 : vector<1x144xf32> to vector<56x144xf32>
    %32 = arith.addf %29, %31 : vector<56x144xf32>
    %cst_18 = arith.constant 0.000000e+00 : f32
    %33 = vector.broadcast %cst_18 : f32 to vector<56x144xf32>
    %34 = arith.maximumf %32, %33 : vector<56x144xf32>
    %c0_19 = arith.constant 0 : index
    %c0_20 = arith.constant 0 : index
    %35 = vector.load %arg4[%c0_19, %c0_20] : memref<24x56xbf16, #tpu.memory_space<vmem>>, vector<24x56xbf16>
    %c55_i32_21 = arith.constant 55 : i32
    %36 = tpu.dynamic_rotate %34 by %c55_i32_21 dim 0 : vector<56x144xf32>, i32 -> vector<56x144xf32>
    %37 = arith.maximumf %34, %36 : vector<56x144xf32>
    %38 = arith.truncf %37 : vector<56x144xf32> to vector<56x144xbf16>
    %cst_22 = arith.constant dense<0.000000e+00> : vector<24x144xf32>
    %39 = tpu.matmul %35, %38, %cst_22 {dimension_numbers = #tpu.dot_dimension_numbers<[1], [0], [0], [1], [0, 0, 1, 1], [], []>} : vector<24x56xbf16>, vector<56x144xbf16>, vector<24x144xf32> -> vector<24x144xf32>
    %40 = arith.truncf %39 : vector<24x144xf32> to vector<24x144xbf16>
    %c0_23 = arith.constant 0 : index
    %c0_24 = arith.constant 0 : index
    %c0_25 = arith.constant 0 : index
    %41 = vector.load %arg5[%c0_23, %c0_24, %c0_25] : memref<2x144x72xbf16, #tpu.memory_space<vmem>>, vector<1x144x72xbf16>
    %42 = vector.shape_cast %41 : vector<1x144x72xbf16> to vector<144x72xbf16>
    %cst_26 = arith.constant dense<0.000000e+00> : vector<24x72xf32>
    %43 = tpu.matmul %40, %42, %cst_26 {dimension_numbers = #tpu.dot_dimension_numbers<[1], [0], [0], [1], [0, 0, 1, 1], [], []>} : vector<24x144xbf16>, vector<144x72xbf16>, vector<24x72xf32> -> vector<24x72xf32>
    %c1_27 = arith.constant 1 : index
    %c0_28 = arith.constant 0 : index
    %c0_29 = arith.constant 0 : index
    %44 = vector.load %arg5[%c1_27, %c0_28, %c0_29] : memref<2x144x72xbf16, #tpu.memory_space<vmem>>, vector<1x144x72xbf16>
    %45 = vector.shape_cast %44 : vector<1x144x72xbf16> to vector<144x72xbf16>
    %cst_30 = arith.constant dense<0.000000e+00> : vector<24x72xf32>
    %46 = tpu.matmul %40, %45, %cst_30 {dimension_numbers = #tpu.dot_dimension_numbers<[1], [0], [0], [1], [0, 0, 1, 1], [], []>} : vector<24x144xbf16>, vector<144x72xbf16>, vector<24x72xf32> -> vector<24x72xf32>
    %47 = arith.maximumf %43, %46 : vector<24x72xf32>
    %48 = arith.truncf %47 : vector<24x72xf32> to vector<24x72xbf16>
    %c0_31 = arith.constant 0 : index
    %c0_32 = arith.constant 0 : index
    %c0_33 = arith.constant 0 : index
    %49 = vector.load %arg6[%c0_31, %c0_32, %c0_33] : memref<5x72x128xbf16, #tpu.memory_space<vmem>>, vector<1x72x128xbf16>
    %50 = vector.shape_cast %49 : vector<1x72x128xbf16> to vector<72x128xbf16>
    %cst_34 = arith.constant dense<0.000000e+00> : vector<24x128xf32>
    %51 = tpu.matmul %48, %50, %cst_34 {dimension_numbers = #tpu.dot_dimension_numbers<[1], [0], [0], [1], [0, 0, 1, 1], [], []>} : vector<24x72xbf16>, vector<72x128xbf16>, vector<24x128xf32> -> vector<24x128xf32>
    %c23_i32 = arith.constant 23 : i32
    %52 = tpu.dynamic_rotate %47 by %c23_i32 dim 0 : vector<24x72xf32>, i32 -> vector<24x72xf32>
    %53 = arith.truncf %52 : vector<24x72xf32> to vector<24x72xbf16>
    %c1_35 = arith.constant 1 : index
    %c0_36 = arith.constant 0 : index
    %c0_37 = arith.constant 0 : index
    %54 = vector.load %arg6[%c1_35, %c0_36, %c0_37] : memref<5x72x128xbf16, #tpu.memory_space<vmem>>, vector<1x72x128xbf16>
    %55 = vector.shape_cast %54 : vector<1x72x128xbf16> to vector<72x128xbf16>
    %cst_38 = arith.constant dense<0.000000e+00> : vector<24x128xf32>
    %56 = tpu.matmul %53, %55, %cst_38 {dimension_numbers = #tpu.dot_dimension_numbers<[1], [0], [0], [1], [0, 0, 1, 1], [], []>} : vector<24x72xbf16>, vector<72x128xbf16>, vector<24x128xf32> -> vector<24x128xf32>
    %57 = arith.addf %51, %56 : vector<24x128xf32>
    %c22_i32 = arith.constant 22 : i32
    %58 = tpu.dynamic_rotate %47 by %c22_i32 dim 0 : vector<24x72xf32>, i32 -> vector<24x72xf32>
    %59 = arith.truncf %58 : vector<24x72xf32> to vector<24x72xbf16>
    %c2_39 = arith.constant 2 : index
    %c0_40 = arith.constant 0 : index
    %c0_41 = arith.constant 0 : index
    %60 = vector.load %arg6[%c2_39, %c0_40, %c0_41] : memref<5x72x128xbf16, #tpu.memory_space<vmem>>, vector<1x72x128xbf16>
    %61 = vector.shape_cast %60 : vector<1x72x128xbf16> to vector<72x128xbf16>
    %cst_42 = arith.constant dense<0.000000e+00> : vector<24x128xf32>
    %62 = tpu.matmul %59, %61, %cst_42 {dimension_numbers = #tpu.dot_dimension_numbers<[1], [0], [0], [1], [0, 0, 1, 1], [], []>} : vector<24x72xbf16>, vector<72x128xbf16>, vector<24x128xf32> -> vector<24x128xf32>
    %63 = arith.addf %57, %62 : vector<24x128xf32>
    %c21_i32 = arith.constant 21 : i32
    %64 = tpu.dynamic_rotate %47 by %c21_i32 dim 0 : vector<24x72xf32>, i32 -> vector<24x72xf32>
    %65 = arith.truncf %64 : vector<24x72xf32> to vector<24x72xbf16>
    %c3_43 = arith.constant 3 : index
    %c0_44 = arith.constant 0 : index
    %c0_45 = arith.constant 0 : index
    %66 = vector.load %arg6[%c3_43, %c0_44, %c0_45] : memref<5x72x128xbf16, #tpu.memory_space<vmem>>, vector<1x72x128xbf16>
    %67 = vector.shape_cast %66 : vector<1x72x128xbf16> to vector<72x128xbf16>
    %cst_46 = arith.constant dense<0.000000e+00> : vector<24x128xf32>
    %68 = tpu.matmul %65, %67, %cst_46 {dimension_numbers = #tpu.dot_dimension_numbers<[1], [0], [0], [1], [0, 0, 1, 1], [], []>} : vector<24x72xbf16>, vector<72x128xbf16>, vector<24x128xf32> -> vector<24x128xf32>
    %69 = arith.addf %63, %68 : vector<24x128xf32>
    %c20_i32 = arith.constant 20 : i32
    %70 = tpu.dynamic_rotate %47 by %c20_i32 dim 0 : vector<24x72xf32>, i32 -> vector<24x72xf32>
    %71 = arith.truncf %70 : vector<24x72xf32> to vector<24x72xbf16>
    %c4_47 = arith.constant 4 : index
    %c0_48 = arith.constant 0 : index
    %c0_49 = arith.constant 0 : index
    %72 = vector.load %arg6[%c4_47, %c0_48, %c0_49] : memref<5x72x128xbf16, #tpu.memory_space<vmem>>, vector<1x72x128xbf16>
    %73 = vector.shape_cast %72 : vector<1x72x128xbf16> to vector<72x128xbf16>
    %cst_50 = arith.constant dense<0.000000e+00> : vector<24x128xf32>
    %74 = tpu.matmul %71, %73, %cst_50 {dimension_numbers = #tpu.dot_dimension_numbers<[1], [0], [0], [1], [0, 0, 1, 1], [], []>} : vector<24x72xbf16>, vector<72x128xbf16>, vector<24x128xf32> -> vector<24x128xf32>
    %75 = arith.addf %69, %74 : vector<24x128xf32>
    %76 = vector.extract_strided_slice %0 {offsets = [1, 0], sizes = [1, 128], strides = [1, 1]} : vector<8x144xf32> to vector<1x128xf32>
    %77 = vector.broadcast %76 : vector<1x128xf32> to vector<24x128xf32>
    %78 = arith.addf %75, %77 : vector<24x128xf32>
    %cst_51 = arith.constant 0.000000e+00 : f32
    %79 = vector.broadcast %cst_51 : f32 to vector<24x128xf32>
    %80 = arith.maximumf %78, %79 : vector<24x128xf32>
    %c0_52 = arith.constant 0 : index
    %c0_53 = arith.constant 0 : index
    %81 = vector.load %arg7[%c0_52, %c0_53] : memref<8x24xbf16, #tpu.memory_space<vmem>>, vector<8x24xbf16>
    %c23_i32_54 = arith.constant 23 : i32
    %82 = tpu.dynamic_rotate %80 by %c23_i32_54 dim 0 : vector<24x128xf32>, i32 -> vector<24x128xf32>
    %83 = arith.maximumf %80, %82 : vector<24x128xf32>
    %84 = arith.truncf %83 : vector<24x128xf32> to vector<24x128xbf16>
    %cst_55 = arith.constant dense<0.000000e+00> : vector<8x128xf32>
    %85 = tpu.matmul %81, %84, %cst_55 {dimension_numbers = #tpu.dot_dimension_numbers<[1], [0], [0], [1], [0, 0, 1, 1], [], []>} : vector<8x24xbf16>, vector<24x128xbf16>, vector<8x128xf32> -> vector<8x128xf32>
    %86 = arith.truncf %85 : vector<8x128xf32> to vector<8x128xbf16>
    %c0_56 = arith.constant 0 : index
    %c0_57 = arith.constant 0 : index
    %c0_58 = arith.constant 0 : index
    %87 = vector.load %arg8[%c0_56, %c0_57, %c0_58] : memref<2x128x64xbf16, #tpu.memory_space<vmem>>, vector<1x128x64xbf16>
    %88 = vector.shape_cast %87 : vector<1x128x64xbf16> to vector<128x64xbf16>
    %cst_59 = arith.constant dense<0.000000e+00> : vector<8x64xf32>
    %89 = tpu.matmul %86, %88, %cst_59 {dimension_numbers = #tpu.dot_dimension_numbers<[1], [0], [0], [1], [0, 0, 1, 1], [], []>} : vector<8x128xbf16>, vector<128x64xbf16>, vector<8x64xf32> -> vector<8x64xf32>
    %c1_60 = arith.constant 1 : index
    %c0_61 = arith.constant 0 : index
    %c0_62 = arith.constant 0 : index
    %90 = vector.load %arg8[%c1_60, %c0_61, %c0_62] : memref<2x128x64xbf16, #tpu.memory_space<vmem>>, vector<1x128x64xbf16>
    %91 = vector.shape_cast %90 : vector<1x128x64xbf16> to vector<128x64xbf16>
    %cst_63 = arith.constant dense<0.000000e+00> : vector<8x64xf32>
    %92 = tpu.matmul %86, %91, %cst_63 {dimension_numbers = #tpu.dot_dimension_numbers<[1], [0], [0], [1], [0, 0, 1, 1], [], []>} : vector<8x128xbf16>, vector<128x64xbf16>, vector<8x64xf32> -> vector<8x64xf32>
    %93 = arith.maximumf %89, %92 : vector<8x64xf32>
    %94 = arith.truncf %93 : vector<8x64xf32> to vector<8x64xbf16>
    %c0_64 = arith.constant 0 : index
    %c0_65 = arith.constant 0 : index
    %c0_66 = arith.constant 0 : index
    %95 = vector.load %arg9[%c0_64, %c0_65, %c0_66] : memref<4x64x120xbf16, #tpu.memory_space<vmem>>, vector<1x64x120xbf16>
    %96 = vector.shape_cast %95 : vector<1x64x120xbf16> to vector<64x120xbf16>
    %cst_67 = arith.constant dense<0.000000e+00> : vector<8x120xf32>
    %97 = tpu.matmul %94, %96, %cst_67 {dimension_numbers = #tpu.dot_dimension_numbers<[1], [0], [0], [1], [0, 0, 1, 1], [], []>} : vector<8x64xbf16>, vector<64x120xbf16>, vector<8x120xf32> -> vector<8x120xf32>
    %c7_i32 = arith.constant 7 : i32
    %98 = tpu.dynamic_rotate %93 by %c7_i32 dim 0 : vector<8x64xf32>, i32 -> vector<8x64xf32>
    %99 = arith.truncf %98 : vector<8x64xf32> to vector<8x64xbf16>
    %c1_68 = arith.constant 1 : index
    %c0_69 = arith.constant 0 : index
    %c0_70 = arith.constant 0 : index
    %100 = vector.load %arg9[%c1_68, %c0_69, %c0_70] : memref<4x64x120xbf16, #tpu.memory_space<vmem>>, vector<1x64x120xbf16>
    %101 = vector.shape_cast %100 : vector<1x64x120xbf16> to vector<64x120xbf16>
    %cst_71 = arith.constant dense<0.000000e+00> : vector<8x120xf32>
    %102 = tpu.matmul %99, %101, %cst_71 {dimension_numbers = #tpu.dot_dimension_numbers<[1], [0], [0], [1], [0, 0, 1, 1], [], []>} : vector<8x64xbf16>, vector<64x120xbf16>, vector<8x120xf32> -> vector<8x120xf32>
    %103 = arith.addf %97, %102 : vector<8x120xf32>
    %c6_i32 = arith.constant 6 : i32
    %104 = tpu.dynamic_rotate %93 by %c6_i32 dim 0 : vector<8x64xf32>, i32 -> vector<8x64xf32>
    %105 = arith.truncf %104 : vector<8x64xf32> to vector<8x64xbf16>
    %c2_72 = arith.constant 2 : index
    %c0_73 = arith.constant 0 : index
    %c0_74 = arith.constant 0 : index
    %106 = vector.load %arg9[%c2_72, %c0_73, %c0_74] : memref<4x64x120xbf16, #tpu.memory_space<vmem>>, vector<1x64x120xbf16>
    %107 = vector.shape_cast %106 : vector<1x64x120xbf16> to vector<64x120xbf16>
    %cst_75 = arith.constant dense<0.000000e+00> : vector<8x120xf32>
    %108 = tpu.matmul %105, %107, %cst_75 {dimension_numbers = #tpu.dot_dimension_numbers<[1], [0], [0], [1], [0, 0, 1, 1], [], []>} : vector<8x64xbf16>, vector<64x120xbf16>, vector<8x120xf32> -> vector<8x120xf32>
    %109 = arith.addf %103, %108 : vector<8x120xf32>
    %c5_i32 = arith.constant 5 : i32
    %110 = tpu.dynamic_rotate %93 by %c5_i32 dim 0 : vector<8x64xf32>, i32 -> vector<8x64xf32>
    %111 = arith.truncf %110 : vector<8x64xf32> to vector<8x64xbf16>
    %c3_76 = arith.constant 3 : index
    %c0_77 = arith.constant 0 : index
    %c0_78 = arith.constant 0 : index
    %112 = vector.load %arg9[%c3_76, %c0_77, %c0_78] : memref<4x64x120xbf16, #tpu.memory_space<vmem>>, vector<1x64x120xbf16>
    %113 = vector.shape_cast %112 : vector<1x64x120xbf16> to vector<64x120xbf16>
    %cst_79 = arith.constant dense<0.000000e+00> : vector<8x120xf32>
    %114 = tpu.matmul %111, %113, %cst_79 {dimension_numbers = #tpu.dot_dimension_numbers<[1], [0], [0], [1], [0, 0, 1, 1], [], []>} : vector<8x64xbf16>, vector<64x120xbf16>, vector<8x120xf32> -> vector<8x120xf32>
    %115 = arith.addf %109, %114 : vector<8x120xf32>
    %116 = vector.extract_strided_slice %0 {offsets = [2, 0], sizes = [1, 120], strides = [1, 1]} : vector<8x144xf32> to vector<1x120xf32>
    %117 = vector.broadcast %116 : vector<1x120xf32> to vector<8x120xf32>
    %118 = arith.addf %115, %117 : vector<8x120xf32>
    %cst_80 = arith.constant 0.000000e+00 : f32
    %119 = vector.broadcast %cst_80 : f32 to vector<8x120xf32>
    %120 = arith.maximumf %118, %119 : vector<8x120xf32>
    %c0_81 = arith.constant 0 : index
    %c0_82 = arith.constant 0 : index
    %121 = vector.load %arg12[%c0_81, %c0_82] : memref<2x8xbf16, #tpu.memory_space<vmem>>, vector<2x8xbf16>
    %122 = arith.truncf %120 : vector<8x120xf32> to vector<8x120xbf16>
    %cst_83 = arith.constant dense<0.000000e+00> : vector<2x120xf32>
    %123 = tpu.matmul %121, %122, %cst_83 {dimension_numbers = #tpu.dot_dimension_numbers<[1], [0], [0], [1], [0, 0, 1, 1], [], []>} : vector<2x8xbf16>, vector<8x120xbf16>, vector<2x120xf32> -> vector<2x120xf32>
    %124 = arith.truncf %123 : vector<2x120xf32> to vector<2x120xbf16>
    %c0_84 = arith.constant 0 : index
    %c0_85 = arith.constant 0 : index
    %125 = vector.load %arg10[%c0_84, %c0_85] : memref<120x84xbf16, #tpu.memory_space<vmem>>, vector<120x84xbf16>
    %cst_86 = arith.constant dense<0.000000e+00> : vector<2x84xf32>
    %126 = tpu.matmul %124, %125, %cst_86 {dimension_numbers = #tpu.dot_dimension_numbers<[1], [0], [0], [1], [0, 0, 1, 1], [], []>} : vector<2x120xbf16>, vector<120x84xbf16>, vector<2x84xf32> -> vector<2x84xf32>
    %127 = vector.extract_strided_slice %0 {offsets = [3, 0], sizes = [1, 84], strides = [1, 1]} : vector<8x144xf32> to vector<1x84xf32>
    %128 = vector.broadcast %127 : vector<1x84xf32> to vector<2x84xf32>
    %129 = arith.addf %126, %128 : vector<2x84xf32>
    %cst_87 = arith.constant 0.000000e+00 : f32
    %130 = vector.broadcast %cst_87 : f32 to vector<2x84xf32>
    %131 = arith.maximumf %129, %130 : vector<2x84xf32>
    %132 = arith.truncf %131 : vector<2x84xf32> to vector<2x84xbf16>
    %c0_88 = arith.constant 0 : index
    %c0_89 = arith.constant 0 : index
    %133 = vector.load %arg11[%c0_88, %c0_89] : memref<84x128xbf16, #tpu.memory_space<vmem>>, vector<84x128xbf16>
    %cst_90 = arith.constant dense<0.000000e+00> : vector<2x128xf32>
    %134 = tpu.matmul %132, %133, %cst_90 {dimension_numbers = #tpu.dot_dimension_numbers<[1], [0], [0], [1], [0, 0, 1, 1], [], []>} : vector<2x84xbf16>, vector<84x128xbf16>, vector<2x128xf32> -> vector<2x128xf32>
    %135 = vector.extract_strided_slice %0 {offsets = [4, 0], sizes = [1, 128], strides = [1, 1]} : vector<8x144xf32> to vector<1x128xf32>
    %136 = vector.broadcast %135 : vector<1x128xf32> to vector<2x128xf32>
    %137 = arith.addf %134, %136 : vector<2x128xf32>
    %c0_91 = arith.constant 0 : index
    %c0_92 = arith.constant 0 : index
    %138 = vector.load %arg13[%c0_91, %c0_92] : memref<2x128xf32, #tpu.memory_space<vmem>>, vector<2x128xf32>
    tpu.vector_store %arg13[%c0_91, %c0_92], %137 {strides = array<i32>} : memref<2x128xf32, #tpu.memory_space<vmem>>, vector<2x128xf32>,
    return
  }
  func.func @transform_0(%arg0: i32) -> (i32, i32) {
    %c0_i32 = arith.constant 0 : i32
    %c0_i32_0 = arith.constant 0 : i32
    return %arg0, %c0_i32 : i32, i32
  }
  func.func @transform_1(%arg0: i32) -> (i32, i32, i32) {
    %c0_i32 = arith.constant 0 : i32
    %c0_i32_0 = arith.constant 0 : i32
    %c0_i32_1 = arith.constant 0 : i32
    %c0_i32_2 = arith.constant 0 : i32
    return %c0_i32, %c0_i32_0, %c0_i32_1 : i32, i32, i32
  }
  func.func @transform_2(%arg0: i32) -> (i32, i32) {
    %c0_i32 = arith.constant 0 : i32
    %c0_i32_0 = arith.constant 0 : i32
    %c0_i32_1 = arith.constant 0 : i32
    return %c0_i32, %c0_i32_0 : i32, i32
  }
  func.func @transform_3(%arg0: i32) -> (i32, i32) {
    %c0_i32 = arith.constant 0 : i32
    %c0_i32_0 = arith.constant 0 : i32
    %c0_i32_1 = arith.constant 0 : i32
    return %c0_i32, %c0_i32_0 : i32, i32
  }
  func.func @transform_4(%arg0: i32) -> (i32, i32, i32) {
    %c0_i32 = arith.constant 0 : i32
    %c0_i32_0 = arith.constant 0 : i32
    %c0_i32_1 = arith.constant 0 : i32
    %c0_i32_2 = arith.constant 0 : i32
    return %c0_i32, %c0_i32_0, %c0_i32_1 : i32, i32, i32
  }
  func.func @transform_5(%arg0: i32) -> (i32, i32, i32) {
    %c0_i32 = arith.constant 0 : i32
    %c0_i32_0 = arith.constant 0 : i32
    %c0_i32_1 = arith.constant 0 : i32
    %c0_i32_2 = arith.constant 0 : i32
    return %c0_i32, %c0_i32_0, %c0_i32_1 : i32, i32, i32
  }
  func.func @transform_6(%arg0: i32) -> (i32, i32) {
    %c0_i32 = arith.constant 0 : i32
    %c0_i32_0 = arith.constant 0 : i32
    %c0_i32_1 = arith.constant 0 : i32
    return %c0_i32, %c0_i32_0 : i32, i32
  }
  func.func @transform_7(%arg0: i32) -> (i32, i32, i32) {
    %c0_i32 = arith.constant 0 : i32
    %c0_i32_0 = arith.constant 0 : i32
    %c0_i32_1 = arith.constant 0 : i32
    %c0_i32_2 = arith.constant 0 : i32
    return %c0_i32, %c0_i32_0, %c0_i32_1 : i32, i32, i32
  }
  func.func @transform_8(%arg0: i32) -> (i32, i32, i32) {
    %c0_i32 = arith.constant 0 : i32
    %c0_i32_0 = arith.constant 0 : i32
    %c0_i32_1 = arith.constant 0 : i32
    %c0_i32_2 = arith.constant 0 : i32
    return %c0_i32, %c0_i32_0, %c0_i32_1 : i32, i32, i32
  }
  func.func @transform_9(%arg0: i32) -> (i32, i32) {
    %c0_i32 = arith.constant 0 : i32
    %c0_i32_0 = arith.constant 0 : i32
    %c0_i32_1 = arith.constant 0 : i32
    return %c0_i32, %c0_i32_0 : i32, i32
  }
  func.func @transform_10(%arg0: i32) -> (i32, i32) {
    %c0_i32 = arith.constant 0 : i32
    %c0_i32_0 = arith.constant 0 : i32
    %c0_i32_1 = arith.constant 0 : i32
    return %c0_i32, %c0_i32_0 : i32, i32
  }
  func.func @transform_11(%arg0: i32) -> (i32, i32) {
    %c0_i32 = arith.constant 0 : i32
    %c0_i32_0 = arith.constant 0 : i32
    %c0_i32_1 = arith.constant 0 : i32
    return %c0_i32, %c0_i32_0 : i32, i32
  }
  func.func @transform_12(%arg0: i32) -> (i32, i32) {
    %c0_i32 = arith.constant 0 : i32
    %c0_i32_0 = arith.constant 0 : i32
    return %arg0, %c0_i32 : i32, i32
  }
}

</mosaic_0001>

<bundles_post_ra>
// kernel: forward.1
= control target key start
LH: loop header
LB: loop body
LE: loop exit
PB: predicated region body
PF: predicated region fallthrough
CT: control target
= control target key end

     0   :  { %17 = vsyncpa [#allocation3], 0  ;;  %s3549_s0 = inlined_call_operand.hbm [shape: f32[56,28], index: 0, kind: input, shape index: {}]   ;;  %s3550_s1 = inlined_call_operand.hbm [shape: bf16[5,28,144], index: 1, kind: input, shape index: {}]   ;;  %s3551_s2 = inlined_call_operand.hbm [shape: f32[8,144], index: 2, kind: input, shape index: {}]   ;;  %s3552_s3 = inlined_call_operand.hbm [shape: bf16[24,56], index: 3, kind: input, shape index: {}]   ;;  %s3553_s4 = inlined_call_operand.hbm [shape: bf16[2,144,72], index: 4, kind: input, shape index: {}]   ;;  %s3554_s5 = inlined_call_operand.hbm [shape: bf16[5,72,128], index: 5, kind: input, shape index: {}]   ;;  %s3555_s6 = inlined_call_operand.vmem [shape: bf16[8,24], index: 6, kind: input, shape index: {}]   ;;  %s3556_s7 = inlined_call_operand.hbm [shape: bf16[2,128,64], index: 7, kind: input, shape index: {}]   ;;  %s3557_s8 = inlined_call_operand.hbm [shape: bf16[4,64,120], index: 8, kind: input, shape index: {}]   ;;  %s3558_s9 = inlined_call_operand.hbm [shape: bf16[120,84], index: 9, kind: input, shape index: {}]   ;;  %s3559_s10 = inlined_call_operand.hbm [shape: bf16[84,128], index: 10, kind: input, shape index: {}]   ;;  %s3560_s11 = inlined_call_operand.vmem [shape: bf16[2,8], index: 11, kind: input, shape index: {}]   ;;  %s3561_s12 = inlined_call_operand.hbm [shape: f32[2,128], index: 12, kind: output, shape index: {}]  }
   0x1   :  { %18 = vsyncpa [#allocation6], 0 }
   0x2   :  { %19 = vsyncpa [#allocation9], 0 }
   0x3   :  { %20 = vsyncpa [#allocation12], 0 }
   0x4   :  { %21 = vsyncpa [#allocation15], 0 }
   0x5   :  { %22 = vsyncpa [#allocation18], 0 }
   0x6   :  { %23 = vsyncpa [#allocation4], 0  ;;  %s41_s23 = sshll.u32 %s3550_s1, 4  ;;  %s3025_s24 = smov [#allocation5]   ;;  %s42_s23 = int_to_ptr.hbm [resolvable:$true] %s41_s23 }
   0x7   :  { %s43_s25 = sshll.u32 %s3025_s24, 4  ;;  %s65_s28 = sshll.u32 %s3552_s3, 4  ;;  %s44_s25 = int_to_ptr.vmem [resolvable:$true] %s43_s25  ;;  %s66_s28 = int_to_ptr.hbm [resolvable:$true] %s65_s28 }
   0x8   :  { %s3026_s29 = smov 128   ;;  %s3027_s30 = smov 8  }
   0x9   :  { %49 = dma.hbm_to_vmem [thread:$0]  %s42_s23, 2560, %s44_s25, [#allocation6], %s3026_s29, %s3026_s29, %s3027_s30  }
   0xa   :  { %s3028_s13 = smov [#allocation8]   ;;  %s3029_s15 = smov 64  }
   0xb   :  { %s67_s14 = sshll.u32 %s3028_s13, 4  ;;  %s3030_s1 = smov 4   ;;  %s68_s14 = int_to_ptr.vmem [resolvable:$true] %s67_s14 }
   0xc   :  { %73 = dma.hbm_to_vmem [thread:$0]  %s66_s28, 192, %s68_s14, [#allocation9], %s3029_s15, %s3029_s15, %s3030_s1  }
   0xd   :  { %s91_s3 = sshll.u32 %s3554_s5, 4  ;;  %s3031_s18 = smov [#allocation11]   ;;  %s92_s3 = int_to_ptr.hbm [resolvable:$true] %s91_s3 }
   0xe   :  { %s93_s19 = sshll.u32 %s3031_s18, 4  ;;  %s119_s22 = sshll.u32 %s3557_s8, 4  ;;  %s94_s19 = int_to_ptr.vmem [resolvable:$true] %s93_s19  ;;  %s120_s22 = int_to_ptr.hbm [resolvable:$true] %s119_s22 }
   0xf   :  { %99 = dma.hbm_to_vmem [thread:$0]  %s92_s3, 2880, %s94_s19, [#allocation12], %s3029_s15, %s3029_s15, %s3030_s1  }
  0x10   :  { %s3032_s23 = smov [#allocation14]   ;;  %s28_s27 = sshll.u32 %s3549_s0, 4  ;;  %s29_s27 = int_to_ptr.hbm [resolvable:$true] %s28_s27 }
  0x11   :  { %s121_s24 = sshll.u32 %s3032_s23, 4  ;;  %s55_s8 = sshll.u32 %s3551_s2, 4  ;;  %s122_s24 = int_to_ptr.vmem [resolvable:$true] %s121_s24  ;;  %s56_s8 = int_to_ptr.hbm [resolvable:$true] %s55_s8 }
  0x12   :  { %127 = dma.hbm_to_vmem [thread:$0]  %s120_s22, 2048, %s122_s24, [#allocation15], %s3029_s15, %s3029_s15, %s3030_s1  }
  0x13   :  { %s3033_s13 = smov [#allocation2]   ;;  %s3034_s16 = smov [#allocation7]  }
  0x14   :  { %s30_s14 = sshll.u32 %s3033_s13, 4  ;;  %s57_s0 = sshll.u32 %s3034_s16, 4  ;;  %s31_s14 = int_to_ptr.vmem [resolvable:$true] %s30_s14  ;;  %s58_s0 = int_to_ptr.vmem [resolvable:$true] %s57_s0 }
  0x15   :  { %36 = dma.hbm_to_vmem [thread:$0]  %s29_s27, 896, %s31_s14, [#allocation3], %s3026_s29, %s3026_s29, %s3027_s30  }
  0x16   :  { %s78_s18 = sshll.u32 %s3553_s4, 4  ;;  %s106_s2 = sshll.u32 %s3556_s7, 4  ;;  %s79_s18 = int_to_ptr.hbm [resolvable:$true] %s78_s18  ;;  %s107_s2 = int_to_ptr.hbm [resolvable:$true] %s106_s2 }
  0x17   :  { %60 = dma.hbm_to_vmem [thread:$0]  %s56_s8, 256, %s58_s0, [#allocation6]  }
  0x18   :  { %s3035_s21 = smov [#allocation10]   ;;  %s3036_s29 = smov [#allocation13]  }
  0x19   :  { %s80_s22 = sshll.u32 %s3035_s21, 4  ;;  %s108_s30 = sshll.u32 %s3036_s29, 4  ;;  %s81_s22 = int_to_ptr.vmem [resolvable:$true] %s80_s22  ;;  %s109_s30 = int_to_ptr.vmem [resolvable:$true] %s108_s30 }
  0x1a   :  { %86 = dma.hbm_to_vmem [thread:$0]  %s79_s18, 2304, %s81_s22, [#allocation9], %s3029_s15, %s3029_s15, %s3030_s1  }
  0x1b   :  { %s132_s4 = sshll.u32 %s3558_s9, 4  ;;  %s145_s26 = sshll.u32 %s3559_s10, 4  ;;  %s133_s4 = int_to_ptr.hbm [resolvable:$true] %s132_s4  ;;  %s146_s26 = int_to_ptr.hbm [resolvable:$true] %s145_s26 }
  0x1c   :  { %114 = dma.hbm_to_vmem [thread:$0]  %s107_s2, 2048, %s109_s30, [#allocation12], %s3029_s15, %s3029_s15, %s3030_s1  }
  0x1d   :  { %s3037_s27 = smov [#allocation16]   ;;  %s3038_s28 = smov [#allocation17]  }
  0x1e   :  { %s134_s5 = sshll.u32 %s3037_s27, 4  ;;  %s147_s9 = sshll.u32 %s3038_s28, 4  ;;  %s135_s5 = int_to_ptr.vmem [resolvable:$true] %s134_s5  ;;  %s148_s9 = int_to_ptr.vmem [resolvable:$true] %s147_s9 }
  0x1f   :  { %140 = dma.hbm_to_vmem [thread:$0]  %s133_s4, 960, %s135_s5, [#allocation15], %s3029_s15, %s3029_s15, %s3030_s1  }
  0x20   :  { %153 = dma.hbm_to_vmem [thread:$0]  %s146_s26, 704, %s148_s9, [#allocation18], %s3029_s15, %s3029_s15, %s3030_s1  }
  0x21   :  { %3011 = dma.done.wait [#allocation3], 896  }
  0x22   :  { %3012 = vsyncadd [#allocation3], 4294966400 }
  0x23   :  { %3013 = dma.done.wait [#allocation6], 2816  }
  0x24   :  { %3014 = vsyncadd [#allocation6], 4294964480 }
  0x25   :  { %3015 = dma.done.wait [#allocation9], 2496  }
  0x26   :  { %3016 = vsyncadd [#allocation9], 4294964800 }
  0x27   :  { %3017 = dma.done.wait [#allocation12], 4928  }
  0x28   :  { %3018 = vsyncadd [#allocation12], 4294962368 }
  0x29   :  { %3019 = dma.done.wait [#allocation15], 3008  }
  0x2a   :  { %3020 = vsyncadd [#allocation15], 4294964288 }
  0x2b   :  { %3021 = dma.done.wait [#allocation18], 704  }
  0x2c   :  { %3022 = vsyncadd [#allocation18], 4294966592  ;;  %v221_v0 = vlaneseq  ;;  %vm271_vm0 = vcmask 1045504   ;;  %v2160_v2 = vld [vmem:[#allocation5 + $0x30] sm:$0xf]  ;;  %v3166_v18 = vld [vmem:[#allocation2] sm:$0xff] }
  0x2d   :  { %v2635_v3 = vld [vmem:[#allocation5 + $0x34] sm:$0x30]  ;;  %v2634_v4 = vld [vmem:[#allocation5 + $0x34] sm:$0xf]  ;;  %v2162_v6 = vld [vmem:[#allocation5 + $0x38] sm:$0x30] }
  0x2e   :  { %v3162_v1 = vshrl.u32 %v221_v0, 7  ;;  %v2161_v5 = vor.u32 %v2635_v3, %v2160_v2  ;;  %v2184_v7 = vld [vmem:[#allocation5 + $0x10] sm:$0xf]  ;;  %v2631_v8 = vld [vmem:[#allocation5 + $0x14] sm:$0x30]  ;;  %v2165_v9 = vor.u32 %v2634_v4, %v2162_v6  ;;  %v214_v32 = vrot.slane %v3166_v18, 1 }
  0x2f   :  { %v2185_v10 = vor.u32 %v2631_v8, %v2184_v7  ;;  %v2630_v11 = vld [vmem:[#allocation5 + $0x14] sm:$0xf]  ;;  %v2186_v12 = vld [vmem:[#allocation5 + $0x18] sm:$0x30]  ;;  %v2152_v13 = vld [vmem:[#allocation5 + $0x20] sm:$0xf] }
  0x30   :  { %vm223_vm1 = vcmp.lt.s32.totalorder %v3162_v1, 7  ;;  %v273_v14 = vsel %vm271_vm0, %v2161_v5, 0  ;;  %v2189_v15 = vor.u32 %v2630_v11, %v2186_v12  ;;  %v2633_v16 = vld [vmem:[#allocation5 + $0x24] sm:$0xf0]  ;;  %v2632_v17 = vld [vmem:[#allocation5 + $0x24] sm:$0xf] }
  0x31   :  { %284 = vmatpush.bf16.msra.mxu0 %v273_v14  ;;  %v276_v19 = vsel %vm271_vm0, %v2165_v9, 0  ;;  %v365_v20 = vsel %vm271_vm0, %v2185_v10, 0  ;;  %v2153_v21 = vor.u32 %v2633_v16, %v2152_v13  ;;  %v2154_v22 = vld [vmem:[#allocation5 + $0x28] sm:$0xf0]  ;;  %v2176_v23 = vld [vmem:[#allocation5] sm:$0xf] }
  0x32   :  { %312 = vmatpush.bf16.msra.mxu1 %v276_v19  ;;  %376 = vmatpush.bf16.msra.mxu2 %v365_v20  ;;  %v368_v24 = vsel %vm271_vm0, %v2189_v15, 0  ;;  %v2157_v25 = vor.u32 %v2632_v17, %v2154_v22  ;;  %v2629_v26 = vld [vmem:[#allocation5 + $0x4] sm:$0xf0]  ;;  %v2628_v27 = vld [vmem:[#allocation5 + $0x4] sm:$0xf]  ;;  %v3171_v28 = vld [vmem:[#allocation2 + $0x8] sm:$0xff] }
  0x33   :  { %404 = vmatpush.bf16.msra.mxu3 %v368_v24  ;;  %v2177_v29 = vor.u32 %v2629_v26, %v2176_v23  ;;  %v2178_v30 = vld [vmem:[#allocation5 + $0x8] sm:$0xf0]  ;;  %v3173_v31 = vld [vmem:[#allocation2 + $0x10] sm:$0xff]  ;;  %v215_v33 = vrot.slane %v3171_v28, 1  ;;  %vm258_vm2 = vcmask 228352   ;;  %v206_v38 = vpack.c.bf16 %v3171_v28, %v3166_v18  ;;  %v3190_v40 = vld [vmem:[#allocation2 + $0x18] sm:$0xff] }
  0x34   :  { %v2181_v34 = vor.u32 %v2628_v27, %v2178_v30  ;;  %v216_v35 = vrot.slane %v3173_v31, 1  ;;  %v3192_v41 = vld [vmem:[#allocation2 + $0x20] sm:$0xff]  ;;  %v217_v42 = vrot.slane %v3190_v40, 1  ;;  %v207_v47 = vpack.c.bf16 %v3190_v40, %v3173_v31  ;;  %v3202_v48 = vld [vmem:[#allocation2 + $0x28] sm:$0xff]  ;;  %v3206_v49 = vld [vmem:[#allocation2 + $0x30] sm:$0xff]  ;;  %s2135_s16 = sshll.u32 %s3561_s12, 4  ;;  %s2136_s16 = int_to_ptr.hbm [resolvable:$true] %s2135_s16 }
  0x35   :  { %285 = vmatpush.bf16.msra.mxu0 %v2153_v21  ;;  %v229_v36 = vsel %vm223_vm1, %v214_v32, %v215_v33  ;;  %v218_v43 = vrot.slane %v3192_v41, 1  ;;  %v219_v50 = vrot.slane %v3202_v48, 1  ;;  %v2208_v51 = vld [vmem:[#allocation5 + $0x50] sm:$0xf]  ;;  %v2639_v52 = vld [vmem:[#allocation5 + $0x54] sm:$0x30]  ;;  %v208_v21 = vpack.c.bf16 %v3202_v48, %v3192_v41 }
  0x36   :  { %313 = vmatpush.bf16.msra.mxu1 %v2157_v25  ;;  %377 = vmatpush.bf16.msra.mxu2 %v2177_v29  ;;  %v228_v37 = vsel %vm223_vm1, %v215_v33, %v216_v35  ;;  %v227_v45 = vsel %vm223_vm1, %v216_v35, %v217_v42  ;;  %v2638_v53 = vld [vmem:[#allocation5 + $0x54] sm:$0xf]  ;;  %v2209_v54 = vor.u32 %v2639_v52, %v2208_v51  ;;  %v2210_v55 = vld [vmem:[#allocation5 + $0x58] sm:$0x30]  ;;  %v2232_v56 = vld [vmem:[#allocation5 + $0x70] sm:$0xf] }
  0x37   :  { %405 = vmatpush.bf16.msra.mxu3 %v2181_v34  ;;  %v231_v39 = vpack.c.bf16 %v228_v37, %v229_v36  ;;  %v226_v44 = vsel %vm223_vm1, %v217_v42, %v218_v43  ;;  %v2643_v57 = vld [vmem:[#allocation5 + $0x74] sm:$0x30]  ;;  %v2213_v58 = vor.u32 %v2638_v53, %v2210_v55  ;;  %v2642_v60 = vld [vmem:[#allocation5 + $0x74] sm:$0xf]  ;;  %v2234_v61 = vld [vmem:[#allocation5 + $0x78] sm:$0x30]  ;;  %v225_v19 = vsel %vm223_vm1, %v218_v43, %v219_v50 }
  0x38   :  { %v232_v46 = vpack.c.bf16 %v226_v44, %v227_v45  ;;  %v2233_v59 = vor.u32 %v2643_v57, %v2232_v56  ;;  %v2200_v62 = vld [vmem:[#allocation5 + $0x40] sm:$0xf]  ;;  %v220_v63 = vrot.slane %v3206_v49, 1  ;;  %v481_v0 = vsel %vm271_vm0, %v2209_v54, 0  ;;  %v2637_v3 = vld [vmem:[#allocation5 + $0x44] sm:$0xf0] }
  0x39   :  { %2166 = vmatmul.msk.bf16.vlgmr.msra.gmra.mxu0 %vm258_vm2, %v231_v39  ;;  %2170 = vmatmul.msk.bf16.vlgmr.msra.gmra.mxu1 %vm258_vm2, %v231_v39  ;;  %v2237_v2 = vor.u32 %v2642_v60, %v2234_v61  ;;  %v2636_v4 = vld [vmem:[#allocation5 + $0x44] sm:$0xf]  ;;  %v484_v5 = vsel %vm271_vm0, %v2213_v58, 0  ;;  %v2201_v7 = vor.u32 %v2637_v3, %v2200_v62  ;;  %v2202_v8 = vld [vmem:[#allocation5 + $0x48] sm:$0xf0]  ;;  %v209_v24 = vpack.c.bf16 %v3206_v49, %v3206_v49 }
  0x3a   :  { %2190 = vmatmul.msk.bf16.vlgmr.msra.gmra.mxu2 %vm258_vm2, %v206_v38  ;;  %2194 = vmatmul.msk.bf16.vlgmr.msra.gmra.mxu3 %vm258_vm2, %v206_v38  ;;  %v611_v6 = vsel %vm271_vm0, %v2233_v59, 0  ;;  %v2224_v9 = vld [vmem:[#allocation5 + $0x60] sm:$0xf]  ;;  %v2205_v11 = vor.u32 %v2636_v4, %v2202_v8  ;;  %v2641_v12 = vld [vmem:[#allocation5 + $0x64] sm:$0xf0]  ;;  %v224_v17 = vsel %vm223_vm1, %v219_v50, %v220_v63  ;;  %v230_v22 = vsel %vm223_vm1, %v220_v63, %v214_v32 }
  0x3b   :  { %492 = vmatpush.bf16.msrb.mxu0 %v481_v0  ;;  %520 = vmatpush.bf16.msrb.mxu1 %v484_v5  ;;  %v614_v10 = vsel %vm271_vm0, %v2237_v2, 0  ;;  %v2640_v13 = vld [vmem:[#allocation5 + $0x64] sm:$0xf]  ;;  %v2225_v14 = vor.u32 %v2641_v12, %v2224_v9  ;;  %v2226_v15 = vld [vmem:[#allocation5 + $0x68] sm:$0xf0]  ;;  %v233_v20 = vpack.c.bf16 %v224_v17, %v225_v19  ;;  %v234_v23 = vpack.c.bf16 %v230_v22, %v230_v22 }
  0x3c   :  { %622 = vmatpush.bf16.msrb.mxu2 %v611_v6  ;;  %650 = vmatpush.bf16.msrb.mxu3 %v614_v10  ;;  %v2229_v16 = vor.u32 %v2640_v13, %v2226_v15  ;;  %v426_v25 = vrot.slane %v3166_v18, 2  ;;  %v427_v26 = vrot.slane %v3171_v28, 2  ;;  %v428_v27 = vrot.slane %v3173_v31, 2  ;;  %v2256_v53 = vld [vmem:[#allocation5 + $0x90] sm:$0xf] }
  0x3d   :  { %vm433_vm3 = vcmp.lt.s32.totalorder %v3162_v1, 6  ;;  %v556_v29 = vrot.slane %v3166_v18, 3  ;;  %v557_v30 = vrot.slane %v3171_v28, 3  ;;  %v558_v32 = vrot.slane %v3173_v31, 3  ;;  %v2647_v54 = vld [vmem:[#allocation5 + $0x94] sm:$0x30] }
  0x3e   :  { %vm563_vm4 = vcmp.lt.s32.totalorder %v3162_v1, 5  ;;  %v438_v33 = vsel %vm433_vm3, %v427_v26, %v428_v27  ;;  %v439_v34 = vsel %vm433_vm3, %v426_v25, %v427_v26  ;;  %v429_v39 = vrot.slane %v3190_v40, 2  ;;  %v2646_v55 = vld [vmem:[#allocation5 + $0x94] sm:$0xf]  ;;  %v2258_v57 = vld [vmem:[#allocation5 + $0x98] sm:$0x30] }
  0x3f   :  { %493 = vmatpush.bf16.msrb.mxu0 %v2201_v7  ;;  %521 = vmatpush.bf16.msrb.mxu1 %v2205_v11  ;;  %v568_v35 = vsel %vm563_vm4, %v557_v30, %v558_v32  ;;  %v569_v36 = vsel %vm563_vm4, %v556_v29, %v557_v30  ;;  %v441_v37 = vpack.c.bf16 %v438_v33, %v439_v34  ;;  %v430_v42 = vrot.slane %v3192_v41, 2  ;;  %v2248_v6 = vld [vmem:[#allocation5 + $0x80] sm:$0xf]  ;;  %v2645_v7 = vld [vmem:[#allocation5 + $0x84] sm:$0xf0] }
  0x40   :  { %623 = vmatpush.bf16.msrb.mxu2 %v2225_v14  ;;  %651 = vmatpush.bf16.msrb.mxu3 %v2229_v16  ;;  %v571_v38 = vpack.c.bf16 %v568_v35, %v569_v36  ;;  %v559_v43 = vrot.slane %v3190_v40, 3  ;;  %v560_v44 = vrot.slane %v3192_v41, 3  ;;  %v2257_v56 = vor.u32 %v2647_v54, %v2256_v53  ;;  %v2644_v8 = vld [vmem:[#allocation5 + $0x84] sm:$0xf]  ;;  %v2250_v11 = vld [vmem:[#allocation5 + $0x88] sm:$0xf0] }
  0x41   :  { %v436_v45 = vsel %vm433_vm3, %v429_v39, %v430_v42  ;;  %v2261_v58 = vor.u32 %v2646_v55, %v2258_v57  ;;  %v431_v60 = vrot.slane %v3202_v48, 2  ;;  %v432_v61 = vrot.slane %v3206_v49, 2 }
  0x42   :  { %v567_v50 = vsel %vm563_vm4, %v558_v32, %v559_v43  ;;  %v741_v59 = vsel %vm271_vm0, %v2257_v56, 0  ;;  %v561_v63 = vrot.slane %v3202_v48, 3  ;;  %v562_v0 = vrot.slane %v3206_v49, 3 }
  0x43   :  { %752 = vmatpush.bf16.msra.mxu0 %v741_v59  ;;  %v744_v62 = vsel %vm271_vm0, %v2261_v58, 0  ;;  %v434_v2 = vsel %vm433_vm3, %v431_v60, %v432_v61  ;;  %v435_v3 = vsel %vm433_vm3, %v430_v42, %v431_v60  ;;  %v2249_v10 = vor.u32 %v2645_v7, %v2248_v6 }
  0x44   :  { %780 = vmatpush.bf16.msra.mxu1 %v744_v62  ;;  %v564_v4 = vsel %vm563_vm4, %v561_v63, %v562_v0  ;;  %v565_v5 = vsel %vm563_vm4, %v560_v44, %v561_v63  ;;  %v443_v9 = vpack.c.bf16 %v434_v2, %v435_v3  ;;  %v2253_v13 = vor.u32 %v2644_v8, %v2250_v11 }
  0x45   :  { %v573_v12 = vpack.c.bf16 %v564_v4, %v565_v5  ;;  %v440_v14 = vsel %vm433_vm3, %v432_v61, %v426_v25  ;;  %v570_v15 = vsel %vm563_vm4, %v562_v0, %v556_v29  ;;  %v686_v19 = vrot.slane %v3166_v18, 4 }
  0x46   :  { %v444_v16 = vpack.c.bf16 %v440_v14, %v440_v14  ;;  %v574_v17 = vpack.c.bf16 %v570_v15, %v570_v15  ;;  %vm693_vm5 = vcmp.lt.s32.totalorder %v3162_v1, 4  ;;  %v689_v32 = vrot.slane %v3190_v40, 4  ;;  %v2687_v1 = vld [vmem:[#allocation13] sm:$0xff] }
  0x47   :  { %753 = vmatpush.bf16.msra.mxu0 %v2249_v10  ;;  %v690_v33 = vrot.slane %v3192_v41, 4  ;;  %vm914_vm6 = vcmask 1043456   ;;  %vm907_vm7 = vcmask 457728   ;;  %vm1033_vm8 = vcmask 130048  }
  0x48   :  { %781 = vmatpush.bf16.msra.mxu1 %v2253_v13  ;;  %vm1244_vm9 = vcmask 588800   ;;  %vm1570_vm10 = vcmask 195584   ;;  %vm1791_vm11 = vcmask 523264   ;;  %vm1957_vm12 = vcmask 64512  }
  0x49   :  { %2167 = vmatmul.msk.bf16.gmra.mxu0 %vm258_vm2, %v232_v46  ;;  %2171 = vmatmul.msk.bf16.gmra.mxu1 %vm258_vm2, %v232_v46  ;;  %v437_v46 = vsel %vm433_vm3, %v428_v27, %v429_v39  ;;  %v696_v34 = vsel %vm693_vm5, %v689_v32, %v690_v33  ;;  %vm2110_vm13 = vcmask 1041408   ;;  %vm2039_vm14 = vcmask 982016  }
  0x4a   :  { %2191 = vmatmul.msk.bf16.gmra.mxu2 %vm258_vm2, %v207_v47  ;;  %2195 = vmatmul.msk.bf16.gmra.mxu3 %vm258_vm2, %v207_v47  ;;  %v566_v47 = vsel %vm563_vm4, %v559_v43, %v560_v44  ;;  %v442_v51 = vpack.c.bf16 %v436_v45, %v437_v46  ;;  %vm2106_vm15 = vcmask 687104  }
  0x4b   :  { %v572_v52 = vpack.c.bf16 %v566_v47, %v567_v50  ;;  %v691_v47 = vrot.slane %v3202_v48, 4  ;;  %v692_v50 = vrot.slane %v3206_v49, 4 }
  0x4d   :  { %v700_v62 = vsel %vm693_vm5, %v692_v50, %v686_v19 }
  0x4e   :  { %v704_v2 = vpack.c.bf16 %v700_v62, %v700_v62 }
  0x59   :  { %2168 = vmatmul.msk.bf16.gmra.mxu0 %vm258_vm2, %v233_v20  ;;  %2172 = vmatmul.msk.bf16.gmra.mxu1 %vm258_vm2, %v233_v20  ;;  %v687_v20 = vrot.slane %v3171_v28, 4 }
  0x5a   :  { %2192 = vmatmul.msk.bf16.gmra.mxu2 %vm258_vm2, %v208_v21  ;;  %2196 = vmatmul.msk.bf16.gmra.mxu3 %vm258_vm2, %v208_v21  ;;  %v688_v21 = vrot.slane %v3173_v31, 4 }
  0x5c   :  { %v698_v22 = vsel %vm693_vm5, %v687_v20, %v688_v21  ;;  %v697_v35 = vsel %vm693_vm5, %v688_v21, %v689_v32 }
  0x69   :  { %2169 = vmatmul.msk.bf16.gmra.mxu0 %vm258_vm2, %v234_v23  ;;  %2173 = vmatmul.msk.bf16.gmra.mxu1 %vm258_vm2, %v234_v23  ;;  %v699_v23 = vsel %vm693_vm5, %v686_v19, %v687_v20 }
  0x6a   :  { %2193 = vmatmul.msk.bf16.gmra.mxu2 %vm258_vm2, %v209_v24  ;;  %2197 = vmatmul.msk.bf16.gmra.mxu3 %vm258_vm2, %v209_v24  ;;  %v701_v24 = vpack.c.bf16 %v698_v22, %v699_v23 }
  0x79   :  { %2214 = vmatmul.msk.bf16.vlgmr.msrb.gmra.mxu0 %vm258_vm2, %v441_v37  ;;  %2218 = vmatmul.msk.bf16.vlgmr.msrb.gmra.mxu1 %vm258_vm2, %v441_v37 }
  0x7a   :  { %2238 = vmatmul.msk.bf16.vlgmr.msrb.gmra.mxu2 %vm258_vm2, %v571_v38  ;;  %2242 = vmatmul.msk.bf16.vlgmr.msrb.gmra.mxu3 %vm258_vm2, %v571_v38  ;;  %v702_v38 = vpack.c.bf16 %v696_v34, %v697_v35 }
  0x89   :  { %2215 = vmatmul.msk.bf16.gmra.mxu0 %vm258_vm2, %v442_v51  ;;  %2219 = vmatmul.msk.bf16.gmra.mxu1 %vm258_vm2, %v442_v51  ;;  %v694_v51 = vsel %vm693_vm5, %v691_v47, %v692_v50 }
  0x8a   :  { %2239 = vmatmul.msk.bf16.gmra.mxu2 %vm258_vm2, %v572_v52  ;;  %2243 = vmatmul.msk.bf16.gmra.mxu3 %vm258_vm2, %v572_v52  ;;  %v695_v52 = vsel %vm693_vm5, %v690_v33, %v691_v47 }
  0x8b   :  { %v703_v55 = vpack.c.bf16 %v694_v51, %v695_v52 }
  0x99   :  { %2216 = vmatmul.msk.bf16.gmra.mxu0 %vm258_vm2, %v443_v9  ;;  %2220 = vmatmul.msk.bf16.gmra.mxu1 %vm258_vm2, %v443_v9 }
  0x9a   :  { %2240 = vmatmul.msk.bf16.gmra.mxu2 %vm258_vm2, %v573_v12  ;;  %2244 = vmatmul.msk.bf16.gmra.mxu3 %vm258_vm2, %v573_v12 }
  0xa9   :  { %2217 = vmatmul.msk.bf16.gmra.mxu0 %vm258_vm2, %v444_v16  ;;  %2221 = vmatmul.msk.bf16.gmra.mxu1 %vm258_vm2, %v444_v16 }
  0xaa   :  { %2241 = vmatmul.msk.bf16.gmra.mxu2 %vm258_vm2, %v574_v17  ;;  %2245 = vmatmul.msk.bf16.gmra.mxu3 %vm258_vm2, %v574_v17 }
  0xb6   :  { %v287_v25 = vpop.f32.mrf.mxu0  ;;  %v315_v26 = vpop.f32.mrf.mxu1 }
  0xb9   :  { %2262 = vmatmul.msk.bf16.vlgmr.msra.gmra.mxu0 %vm258_vm2, %v701_v24  ;;  %2266 = vmatmul.msk.bf16.vlgmr.msra.gmra.mxu1 %vm258_vm2, %v701_v24 }
  0xbd   :  { %v379_v18 = vpop.f32.mrf.mxu2  ;;  %v407_v27 = vpop.f32.mrf.mxu3 }
  0xbe   :  { %v380_v28 = vadd.f32 %v379_v18, %v287_v25  ;;  %v408_v29 = vadd.f32 %v407_v27, %v315_v26  ;;  %v3312_v31 = vpop.f32.mrf.mxu0  ;;  %v3314_v30 = vpop.f32.mrf.mxu1 }
  0xc5   :  { %v3322_v36 = vpop.f32.mrf.mxu2  ;;  %v3324_v37 = vpop.f32.mrf.mxu3 }
  0xc6   :  { %v292_v39 = vpop.f32.mrf.mxu0  ;;  %v320_v42 = vpop.f32.mrf.mxu1 }
  0xc9   :  { %2263 = vmatmul.msk.bf16.gmra.mxu0 %vm258_vm2, %v702_v38  ;;  %2267 = vmatmul.msk.bf16.gmra.mxu1 %vm258_vm2, %v702_v38 }
  0xcd   :  { %v384_v40 = vpop.f32.mrf.mxu2  ;;  %v412_v43 = vpop.f32.mrf.mxu3 }
  0xce   :  { %v385_v41 = vadd.f32 %v384_v40, %v292_v39  ;;  %v413_v44 = vadd.f32 %v412_v43, %v320_v42  ;;  %v3328_v45 = vpop.f32.mrf.mxu0  ;;  %v3330_v46 = vpop.f32.mrf.mxu1 }
  0xd5   :  { %v3338_v53 = vpop.f32.mrf.mxu2  ;;  %v3340_v54 = vpop.f32.mrf.mxu3 }
  0xd6   :  { %v297_v56 = vpop.f32.mrf.mxu0  ;;  %v325_v57 = vpop.f32.mrf.mxu1 }
  0xd9   :  { %2264 = vmatmul.msk.bf16.gmra.mxu0 %vm258_vm2, %v703_v55  ;;  %2268 = vmatmul.msk.bf16.gmra.mxu1 %vm258_vm2, %v703_v55 }
  0xdd   :  { %v389_v48 = vpop.f32.mrf.mxu2  ;;  %v417_v58 = vpop.f32.mrf.mxu3 }
  0xde   :  { %v390_v49 = vadd.f32 %v389_v48, %v297_v56  ;;  %v418_v59 = vadd.f32 %v417_v58, %v325_v57  ;;  %v299_v60 = vpop.f32.mrf.mxu0  ;;  %v327_v61 = vpop.f32.mrf.mxu1 }
  0xe5   :  { %v391_v63 = vpop.f32.mrf.mxu2  ;;  %v419_v0 = vpop.f32.mrf.mxu3 }
  0xe6   :  { %v302_v3 = vpop.f32.mrf.mxu0  ;;  %v330_v4 = vpop.f32.mrf.mxu1  ;;  %v392_v57 = vadd.f32 %v391_v63, %v299_v60  ;;  %v420_v48 = vadd.f32 %v419_v0, %v327_v61 }
  0xe9   :  { %2265 = vmatmul.msk.bf16.gmra.mxu0 %vm258_vm2, %v704_v2  ;;  %2269 = vmatmul.msk.bf16.gmra.mxu1 %vm258_vm2, %v704_v2 }
  0xed   :  { %v394_v5 = vpop.f32.mrf.mxu2  ;;  %v422_v6 = vpop.f32.mrf.mxu3 }
  0xee   :  { %v3348_v7 = vadd.f32 %v394_v5, %v302_v3  ;;  %v3350_v8 = vadd.f32 %v422_v6, %v330_v4  ;;  %v304_v9 = vpop.f32.mrf.mxu0  ;;  %v332_v10 = vpop.f32.mrf.mxu1 }
  0xf5   :  { %v396_v11 = vpop.f32.mrf.mxu2  ;;  %v424_v12 = vpop.f32.mrf.mxu3 }
  0xf6   :  { %v495_v13 = vpop.f32.mrf.mxu0  ;;  %v523_v14 = vpop.f32.mrf.mxu1  ;;  %v382_v12 = vadd.f32 %v3322_v36, %v3312_v31 }
  0xf7   :  { %v542_v15 = vadd.f32 %v495_v13, %v380_v28  ;;  %v543_v16 = vadd.f32 %v523_v14, %v408_v29  ;;  %v410_v13 = vadd.f32 %v3324_v37, %v3314_v30 }
  0xfd   :  { %v625_v17 = vpop.f32.mrf.mxu2  ;;  %v653_v19 = vpop.f32.mrf.mxu3 }
  0xfe   :  { %v672_v20 = vadd.f32 %v625_v17, %v542_v15  ;;  %v673_v21 = vadd.f32 %v653_v19, %v543_v16  ;;  %v497_v22 = vpop.f32.mrf.mxu0  ;;  %v525_v23 = vpop.f32.mrf.mxu1  ;;  %v3380_v16 = vld [vmem:[#allocation7] sm:$0xff]  ;;  %v198_v17 = vld [vmem:[#allocation7 + $0x8] sm:$0xff] }
  0xff   :  { %v544_v14 = vadd.f32 %v497_v22, %v382_v12  ;;  %v545_v15 = vadd.f32 %v525_v23, %v410_v13 }
 0x105   :  { %v627_v24 = vpop.f32.mrf.mxu2  ;;  %v655_v25 = vpop.f32.mrf.mxu3 }
 0x106   :  { %v500_v26 = vpop.f32.mrf.mxu0  ;;  %v528_v18 = vpop.f32.mrf.mxu1  ;;  %v674_v19 = vadd.f32 %v627_v24, %v544_v14 }
 0x107   :  { %v546_v27 = vadd.f32 %v500_v26, %v385_v41  ;;  %v547_v32 = vadd.f32 %v528_v18, %v413_v44  ;;  %v675_v26 = vadd.f32 %v655_v25, %v545_v15  ;;  %v3383_v18 = vperm.slane %v3380_v16, 0 }
 0x10d   :  { %v630_v33 = vpop.f32.mrf.mxu2  ;;  %v658_v34 = vpop.f32.mrf.mxu3 }
 0x10e   :  { %v676_v35 = vadd.f32 %v630_v33, %v546_v27  ;;  %v677_v38 = vadd.f32 %v658_v34, %v547_v32  ;;  %v3352_v39 = vpop.f32.mrf.mxu0  ;;  %v3354_v28 = vpop.f32.mrf.mxu1  ;;  %v3385_v27 = vperm.slane %v198_v17, 0 }
 0x115   :  { %v3356_v29 = vpop.f32.mrf.mxu2  ;;  %v3358_v42 = vpop.f32.mrf.mxu3 }
 0x116   :  { %v505_v40 = vpop.f32.mrf.mxu0  ;;  %v533_v43 = vpop.f32.mrf.mxu1 }
 0x117   :  { %v550_v47 = vadd.f32 %v505_v40, %v390_v49  ;;  %v551_v50 = vadd.f32 %v533_v43, %v418_v59 }
 0x11d   :  { %v635_v51 = vpop.f32.mrf.mxu2  ;;  %v663_v52 = vpop.f32.mrf.mxu3 }
 0x11e   :  { %v3360_v41 = vadd.f32 %v635_v51, %v550_v47  ;;  %v3362_v44 = vadd.f32 %v663_v52, %v551_v50  ;;  %v507_v55 = vpop.f32.mrf.mxu0  ;;  %v535_v56 = vpop.f32.mrf.mxu1 }
 0x11f   :  { %v552_v58 = vadd.f32 %v507_v55, %v392_v57  ;;  %v553_v62 = vadd.f32 %v535_v56, %v420_v48 }
 0x125   :  { %v637_v2 = vpop.f32.mrf.mxu2  ;;  %v665_v3 = vpop.f32.mrf.mxu3 }
 0x126   :  { %v3364_v4 = vadd.f32 %v637_v2, %v552_v58  ;;  %v3366_v5 = vadd.f32 %v665_v3, %v553_v62  ;;  %v3368_v49 = vpop.f32.mrf.mxu0  ;;  %v3370_v59 = vpop.f32.mrf.mxu1 }
 0x12d   :  { %v3372_v6 = vpop.f32.mrf.mxu2  ;;  %v3374_v9 = vpop.f32.mrf.mxu3 }
 0x12e   :  { %v512_v10 = vpop.f32.mrf.mxu0  ;;  %v540_v11 = vpop.f32.mrf.mxu1 }
 0x135   :  { %v642_v60 = vpop.f32.mrf.mxu2  ;;  %v670_v61 = vpop.f32.mrf.mxu3 }
 0x136   :  { %v755_v63 = vpop.f32.mrf.mxu0  ;;  %v783_v0 = vpop.f32.mrf.mxu1 }
 0x137   :  { %v802_v34 = vadd.f32 %v755_v63, %v672_v20  ;;  %v803_v40 = vadd.f32 %v783_v0, %v673_v21  ;;  %v387_v20 = vadd.f32 %v3338_v53, %v3328_v45  ;;  %v415_v21 = vadd.f32 %v3340_v54, %v3330_v46 }
 0x139   :  { %v818_v22 = vadd.f32 %v3383_v18, %v802_v34  ;;  %v819_v23 = vadd.f32 %v3385_v27, %v803_v40  ;;  %v548_v62 = vadd.f32 %v3352_v39, %v387_v20  ;;  %v549_v2 = vadd.f32 %v3354_v28, %v415_v21 }
 0x13b   :  { %v832_v50 = vmax.f32 %v818_v22, 0.0  ;;  %v833_v51 = vmax.f32 %v819_v23, 0.0  ;;  %v678_v45 = vadd.f32 %v3356_v29, %v548_v62  ;;  %v679_v46 = vadd.f32 %v3358_v42, %v549_v2 }
 0x13d   :  { %v3399_v3 = vrot.slane %v832_v50, 1 }
 0x13e   :  { %v757_v32 = vpop.f32.mrf.mxu0  ;;  %v785_v33 = vpop.f32.mrf.mxu1 }
 0x13f   :  { %v804_v31 = vadd.f32 %v757_v32, %v674_v19  ;;  %v805_v36 = vadd.f32 %v785_v33, %v675_v26 }
 0x141   :  { %v820_v30 = vadd.f32 %v3383_v18, %v804_v31  ;;  %v821_v37 = vadd.f32 %v3385_v27, %v805_v36 }
 0x143   :  { %v834_v24 = vmax.f32 %v820_v30, 0.0  ;;  %v835_v25 = vmax.f32 %v821_v37, 0.0 }
 0x145   :  { %v851_v56 = vrot.slane %v834_v24, 1  ;;  %v852_v57 = vrot.slane %v835_v25, 1 }
 0x146   :  { %v760_v43 = vpop.f32.mrf.mxu0  ;;  %v788_v47 = vpop.f32.mrf.mxu1 }
 0x147   :  { %v806_v52 = vadd.f32 %v760_v43, %v676_v35  ;;  %v807_v55 = vadd.f32 %v788_v47, %v677_v38  ;;  %v3401_v35 = vrot.slane %v833_v51, 1  ;;  %v873_v11 = vsel %vm223_vm1, %v3399_v3, %v851_v56 }
 0x148   :  { %v3415_v42 = vmax.f32 %v832_v50, %v873_v11 }
 0x149   :  { %v822_v48 = vadd.f32 %v3383_v18, %v806_v52  ;;  %v823_v58 = vadd.f32 %v3385_v27, %v807_v55  ;;  %v874_v39 = vsel %vm223_vm1, %v3401_v35, %v852_v57 }
 0x14a   :  { %v3419_v13 = vmax.f32 %v833_v51, %v874_v39 }
 0x14b   :  { %v836_v38 = vmax.f32 %v822_v48, 0.0  ;;  %v837_v10 = vmax.f32 %v823_v58, 0.0 }
 0x14d   :  { %v853_v53 = vrot.slane %v836_v38, 1  ;;  %v854_v54 = vrot.slane %v837_v10, 1 }
 0x14e   :  { %v762_v28 = vpop.f32.mrf.mxu0  ;;  %v790_v60 = vpop.f32.mrf.mxu1 }
 0x14f   :  { %v808_v61 = vadd.f32 %v762_v28, %v678_v45  ;;  %v809_v63 = vadd.f32 %v790_v60, %v679_v46  ;;  %v871_v0 = vsel %vm223_vm1, %v851_v56, %v853_v53  ;;  %v872_v29 = vsel %vm223_vm1, %v852_v57, %v854_v54 }
 0x150   :  { %v3417_v12 = vmax.f32 %v834_v24, %v871_v0  ;;  %v3421_v14 = vmax.f32 %v835_v25, %v872_v29 }
 0x151   :  { %v824_v15 = vadd.f32 %v3383_v18, %v808_v61  ;;  %v825_v17 = vadd.f32 %v3385_v27, %v809_v63 }
 0x152   :  { %v891_v19 = vpack.c.bf16 %v3417_v12, %v3415_v42  ;;  %v892_v26 = vpack.c.bf16 %v3421_v14, %v3419_v13  ;;  %v2652_v42 = vld [vmem:[#allocation10 + $0x18] sm:$0xff]  ;;  %v2661_v13 = vld [vmem:[#allocation10 + $0x60] sm:$0xff]  ;;  %v2651_v14 = vld [vmem:[#allocation10 + $0x10] sm:$0xff] }
 0x153   :  { %v838_v32 = vmax.f32 %v824_v15, 0.0  ;;  %v839_v33 = vmax.f32 %v825_v17, 0.0 }
 0x155   :  { %v855_v30 = vrot.slane %v838_v32, 1  ;;  %v856_v37 = vrot.slane %v839_v33, 1 }
 0x156   :  { %v765_v34 = vpop.f32.mrf.mxu0  ;;  %v793_v40 = vpop.f32.mrf.mxu1 }
 0x157   :  { %v810_v31 = vadd.f32 %v765_v34, %v3360_v41  ;;  %v811_v36 = vadd.f32 %v793_v40, %v3362_v44  ;;  %v869_v50 = vsel %vm223_vm1, %v853_v53, %v855_v30  ;;  %v870_v51 = vsel %vm223_vm1, %v854_v54, %v856_v37 }
 0x158   :  { %v881_v56 = vmax.f32 %v836_v38, %v869_v50  ;;  %v882_v48 = vmax.f32 %v837_v10, %v870_v51  ;;  %v2663_v50 = vld [vmem:[#allocation10 + $0x70] sm:$0xff]  ;;  %v2656_v51 = vld [vmem:[#allocation10 + $0x38] sm:$0xff] }
 0x159   :  { %v826_v22 = vadd.f32 %v3383_v18, %v810_v31  ;;  %v827_v23 = vadd.f32 %v3385_v27, %v811_v36 }
 0x15b   :  { %v840_v24 = vmax.f32 %v826_v22, 0.0  ;;  %v841_v25 = vmax.f32 %v827_v23, 0.0 }
 0x15d   :  { %v857_v43 = vrot.slane %v840_v24, 1  ;;  %v858_v47 = vrot.slane %v841_v25, 1 }
 0x15e   :  { %v767_v52 = vpop.f32.mrf.mxu0  ;;  %v795_v41 = vpop.f32.mrf.mxu1 }
 0x15f   :  { %v812_v44 = vadd.f32 %v767_v52, %v3364_v4  ;;  %v813_v55 = vadd.f32 %v795_v41, %v3366_v5  ;;  %v867_v20 = vsel %vm223_vm1, %v855_v30, %v857_v43  ;;  %v868_v21 = vsel %vm223_vm1, %v856_v37, %v858_v47  ;;  %v2662_v52 = vld [vmem:[#allocation10 + $0x68] sm:$0xff]  ;;  %v2648_v41 = vld [vmem:[#allocation8] sm:$0xff] }
 0x160   :  { %v883_v57 = vmax.f32 %v838_v32, %v867_v20  ;;  %v884_v58 = vmax.f32 %v839_v33, %v868_v21  ;;  %v554_v4 = vadd.f32 %v3368_v49, %v3348_v7  ;;  %v555_v5 = vadd.f32 %v3370_v59, %v3350_v8  ;;  %v848_v20 = vld [vmem:[#allocation8 + $0x8] sm:$0xf]  ;;  %v2653_v21 = vld [vmem:[#allocation10 + $0x20] sm:$0xff] }
 0x161   :  { %v828_v62 = vadd.f32 %v3383_v18, %v812_v44  ;;  %v829_v2 = vadd.f32 %v3385_v27, %v813_v55  ;;  %v2655_v44 = vld [vmem:[#allocation10 + $0x30] sm:$0xff]  ;;  %v2654_v55 = vld [vmem:[#allocation10 + $0x28] sm:$0xff] }
 0x162   :  { %v893_v45 = vpack.c.bf16 %v883_v57, %v881_v56  ;;  %v894_v46 = vpack.c.bf16 %v884_v58, %v882_v48  ;;  %v684_v11 = vadd.f32 %v3372_v6, %v554_v4  ;;  %v685_v38 = vadd.f32 %v3374_v9, %v555_v5  ;;  %v2650_v57 = vld [vmem:[#allocation10 + $0x8] sm:$0xff]  ;;  %v2659_v48 = vld [vmem:[#allocation10 + $0x50] sm:$0xff]  ;;  %v2649_v58 = vld [vmem:[#allocation10] sm:$0xff] }
 0x163   :  { %v842_v53 = vmax.f32 %v828_v62, 0.0  ;;  %v843_v54 = vmax.f32 %v829_v2, 0.0  ;;  %v904_v56 = vunpack.c.l.b16 %v848_v20  ;;  %v2657_v62 = vld [vmem:[#allocation10 + $0x40] sm:$0xff]  ;;  %v2658_v2 = vld [vmem:[#allocation10 + $0x48] sm:$0xff] }
 0x165   :  { %v859_v10 = vrot.slane %v842_v53, 1  ;;  %v860_v39 = vrot.slane %v843_v54, 1  ;;  %v906_v12 = vpack.c.b16 %v904_v56, %v904_v56 }
 0x166   :  { %v770_v28 = vpop.f32.mrf.mxu0  ;;  %v798_v60 = vpop.f32.mrf.mxu1 }
 0x167   :  { %v814_v61 = vadd.f32 %v770_v28, %v684_v11  ;;  %v815_v63 = vadd.f32 %v798_v60, %v685_v38  ;;  %v865_v0 = vsel %vm223_vm1, %v857_v43, %v859_v10  ;;  %v866_v7 = vsel %vm223_vm1, %v858_v47, %v860_v39  ;;  %v2664_v47 = vld [vmem:[#allocation10 + $0x78] sm:$0xff] }
 0x168   :  { %v885_v49 = vmax.f32 %v840_v24, %v865_v0  ;;  %v886_v8 = vmax.f32 %v841_v25, %v866_v7 }
 0x169   :  { %v830_v59 = vadd.f32 %v3383_v18, %v814_v61  ;;  %v831_v6 = vadd.f32 %v3385_v27, %v815_v63 }
 0x16b   :  { %v844_v29 = vmax.f32 %v830_v59, 0.0  ;;  %v845_v9 = vmax.f32 %v831_v6, 0.0  ;;  %v1343_v59 = vld [vmem:[#allocation11 + $0x68] sm:$0xf]  ;;  %v1418_v6 = vld [vmem:[#allocation11 + $0x8c] sm:$0xf] }
 0x16d   :  { %v861_v15 = vrot.slane %v844_v29, 1  ;;  %v862_v17 = vrot.slane %v845_v9, 1 }
 0x16e   :  { %v772_v32 = vpop.f32.mrf.mxu0  ;;  %v800_v33 = vpop.f32.mrf.mxu1 }
 0x16f   :  { %v875_v34 = vsel %vm223_vm1, %v861_v15, %v3399_v3  ;;  %v876_v40 = vsel %vm223_vm1, %v862_v17, %v3401_v35  ;;  %v863_v31 = vsel %vm223_vm1, %v859_v10, %v861_v15  ;;  %v864_v18 = vsel %vm223_vm1, %v860_v39, %v862_v17  ;;  %v2665_v35 = vld [vmem:[#allocation10 + $0x80] sm:$0xff] }
 0x170   :  { %v889_v27 = vmax.f32 %v844_v29, %v875_v34  ;;  %v890_v36 = vmax.f32 %v845_v9, %v876_v40  ;;  %v887_v30 = vmax.f32 %v842_v53, %v863_v31  ;;  %v888_v37 = vmax.f32 %v843_v54, %v864_v18  ;;  %1149 = vmatpush.bf16.msrb.mxu0 %v2665_v35  ;;  %v2669_v29 = vld [vmem:[#allocation11 + $0x10] sm:$0xff] }
 0x171   :  { %v1361_v15 = vunpack.c.l.b16 %v1343_v59  ;;  %v1436_v17 = vunpack.c.l.b16 %v1418_v6  ;;  %v2680_v35 = vld [vmem:[#allocation11 + $0x74] sm:$0xff] }
 0x172   :  { %v897_v22 = vpack.c.bf16 %v889_v27, %v889_v27  ;;  %v898_v23 = vpack.c.bf16 %v890_v36, %v890_v36  ;;  %v895_v24 = vpack.c.bf16 %v887_v30, %v885_v49  ;;  %v896_v25 = vpack.c.bf16 %v888_v37, %v886_v8  ;;  %v2670_v49 = vld [vmem:[#allocation11 + $0x18] sm:$0xff]  ;;  %v1216_v8 = vld [vmem:[#allocation11 + $0x44] sm:$0xf]  ;;  %v2668_v27 = vld [vmem:[#allocation11 + $0x8] sm:$0xff] }
 0x173   :  { %v1234_v9 = vunpack.c.l.b16 %v1216_v8  ;;  %v1366_v33 = vpack.c.b16 %v1361_v15, %v1361_v15  ;;  %v1441_v34 = vpack.c.b16 %v1436_v17, %v1436_v17  ;;  %v2674_v36 = vld [vmem:[#allocation11 + $0x3c] sm:$0xff]  ;;  %v2682_v37 = vld [vmem:[#allocation11 + $0x84] sm:$0xff]  ;;  %v2683_v15 = vld [vmem:[#allocation11 + $0x90] sm:$0xff] }
 0x174   :  { %v916_v3 = vsel %vm914_vm6, %v897_v22, 0  ;;  %v919_v43 = vsel %vm914_vm6, %v898_v23, 0  ;;  %1150 = vmatpush.bf16.msrb.mxu0 %v2664_v47  ;;  %v2678_v30 = vld [vmem:[#allocation11 + $0x60] sm:$0xff]  ;;  %v2673_v23 = vld [vmem:[#allocation11 + $0x34] sm:$0xff] }
 0x175   :  { %925 = vmatpush.bf16.msra.mxu2 %v916_v3  ;;  %943 = vmatpush.bf16.msra.mxu3 %v919_v43  ;;  %v1239_v32 = vpack.c.b16 %v1234_v9, %v1234_v9  ;;  %v1378_v31 = vsel %vm914_vm6, %v1366_v33, 0  ;;  %v1453_v18 = vsel %vm914_vm6, %v1441_v34, 0  ;;  %v2667_v22 = vld [vmem:[#allocation11] sm:$0xff]  ;;  %v2672_v3 = vld [vmem:[#allocation11 + $0x2c] sm:$0xff] }
 0x176   :  { %v2676_v43 = vld [vmem:[#allocation11 + $0x50] sm:$0xff]  ;;  %v2671_v47 = vld [vmem:[#allocation11 + $0x24] sm:$0xff] }
 0x177   :  { %v1252_v40 = vsel %vm914_vm6, %v1239_v32, 0 }
 0x178   :  { %1151 = vmatpush.bf16.msrb.mxu0 %v2663_v50  ;;  %v2675_v50 = vld [vmem:[#allocation11 + $0x48] sm:$0xff] }
 0x179   :  { %926 = vmatpush.bf16.msra.mxu2 %v895_v24  ;;  %944 = vmatpush.bf16.msra.mxu3 %v896_v25  ;;  %v2677_v24 = vld [vmem:[#allocation11 + $0x58] sm:$0xff] }
 0x17a   :  { %v2681_v25 = vld [vmem:[#allocation11 + $0x7c] sm:$0xff] }
 0x17c   :  { %1152 = vmatpush.bf16.msrb.mxu0 %v2662_v52 }
 0x17d   :  { %927 = vmatpush.bf16.msra.mxu2 %v893_v45  ;;  %945 = vmatpush.bf16.msra.mxu3 %v894_v46  ;;  %v1198_v45 = vld [vmem:[#allocation11 + $0x20] sm:$0xf] }
 0x17e   :  { %v1289_v46 = vunpack.c.l.b16 %v1198_v45 }
 0x180   :  { %1153 = vmatpush.bf16.msrb.mxu0 %v2661_v13  ;;  %v1294_v4 = vpack.c.b16 %v1289_v46, %v1289_v46 }
 0x181   :  { %928 = vmatpush.bf16.msra.mxu2 %v891_v19  ;;  %946 = vmatpush.bf16.msra.mxu3 %v892_v26  ;;  %v2660_v19 = vld [vmem:[#allocation10 + $0x58] sm:$0xff]  ;;  %v2666_v26 = vld [vmem:[#allocation10 + $0x88] sm:$0xff] }
 0x182   :  { %1174 = vmatpush.bf16.msrb.mxu1 %v2666_v26  ;;  %v1306_v54 = vsel %vm914_vm6, %v1294_v4, 0  ;;  %v2686_v4 = vld [vmem:[#allocation11 + $0xa8] sm:$0xff] }
 0x184   :  { %2274 = vmatmul.msk.bf16.vlgmr.msra.gmra.mxu2 %vm907_vm7, %v2648_v41  ;;  %2276 = vmatmul.msk.bf16.vlgmr.msra.gmra.mxu3 %vm907_vm7, %v2648_v41 }
 0x185   :  { %1040 = vmatpush.bf16.msrb.mxu2 %v2656_v51  ;;  %1154 = vmatpush.bf16.msrb.mxu0 %v2660_v19  ;;  %v2679_v51 = vld [vmem:[#allocation11 + $0x6c] sm:$0xff] }
 0x186   :  { %1065 = vmatpush.bf16.msrb.mxu3 %v2657_v62  ;;  %1458 = vmatpush.bf16.msra.mxu1 %v1453_v18 }
 0x189   :  { %1041 = vmatpush.bf16.msrb.mxu2 %v2655_v44  ;;  %1155 = vmatpush.bf16.msrb.mxu0 %v2659_v48  ;;  %v1493_v44 = vld [vmem:[#allocation11 + $0xb0] sm:$0xf] }
 0x18a   :  { %1311 = vmatpush.bf16.msra.mxu3 %v1306_v54  ;;  %1459 = vmatpush.bf16.msra.mxu1 %v2682_v37 }
 0x18d   :  { %1042 = vmatpush.bf16.msrb.mxu2 %v2654_v55  ;;  %1156 = vmatpush.bf16.msrb.mxu0 %v2658_v2 }
 0x18e   :  { %1312 = vmatpush.bf16.msra.mxu3 %v2670_v49  ;;  %1460 = vmatpush.bf16.msra.mxu1 %v2681_v25 }
 0x191   :  { %1043 = vmatpush.bf16.msrb.mxu2 %v2653_v21  ;;  %1383 = vmatpush.bf16.msra.mxu0 %v1378_v31  ;;  %v1511_v21 = vunpack.c.l.b16 %v1493_v44 }
 0x192   :  { %1313 = vmatpush.bf16.msra.mxu3 %v2669_v29  ;;  %1461 = vmatpush.bf16.msra.mxu1 %v2680_v35 }
 0x193   :  { %v1516_v56 = vpack.c.b16 %v1511_v21, %v1511_v21 }
 0x194   :  { %2275 = vmatmul.msk.bf16.gmra.mxu2 %vm907_vm7, %v906_v12  ;;  %2277 = vmatmul.msk.bf16.gmra.mxu3 %vm907_vm7, %v906_v12 }
 0x195   :  { %1044 = vmatpush.bf16.msrb.mxu2 %v2652_v42  ;;  %1384 = vmatpush.bf16.msra.mxu0 %v2678_v30  ;;  %v1528_v13 = vsel %vm914_vm6, %v1516_v56, 0 }
 0x196   :  { %1314 = vmatpush.bf16.msra.mxu3 %v2668_v27  ;;  %1462 = vmatpush.bf16.msra.mxu1 %v2679_v51 }
 0x199   :  { %1045 = vmatpush.bf16.msrb.mxu2 %v2651_v14  ;;  %1385 = vmatpush.bf16.msra.mxu0 %v2677_v24 }
 0x19a   :  { %1315 = vmatpush.bf16.msra.mxu3 %v2667_v22 }
 0x19d   :  { %1046 = vmatpush.bf16.msrb.mxu2 %v2650_v57  ;;  %1386 = vmatpush.bf16.msra.mxu0 %v2676_v43 }
 0x1a1   :  { %1047 = vmatpush.bf16.msrb.mxu2 %v2649_v58  ;;  %1387 = vmatpush.bf16.msra.mxu0 %v2675_v50 }
 0x1a5   :  { %1257 = vmatpush.bf16.msra.mxu2 %v1252_v40 }
 0x1a9   :  { %1258 = vmatpush.bf16.msra.mxu2 %v2674_v36 }
 0x1ad   :  { %1259 = vmatpush.bf16.msra.mxu2 %v2673_v23 }
 0x1b1   :  { %1260 = vmatpush.bf16.msra.mxu2 %v2672_v3 }
 0x1b5   :  { %1261 = vmatpush.bf16.msra.mxu2 %v2671_v47 }
 0x207   :  { %v930_v5 = vpop.f32.mrf.mxu2  ;;  %v948_v53 = vpop.f32.mrf.mxu3 }
 0x20f   :  { %v932_v11 = vpop.f32.mrf.mxu2  ;;  %v950_v38 = vpop.f32.mrf.mxu3 }
 0x210   :  { %v957_v10 = vpack.c.bf16 %v932_v11, %v930_v5  ;;  %v958_v39 = vpack.c.bf16 %v950_v38, %v948_v53  ;;  %v2685_v53 = vld [vmem:[#allocation11 + $0xa0] sm:$0xff] }
 0x212   :  { %1048 = vmatmul.bf16.vlgmr.msrb.gmra.mxu2 %v957_v10  ;;  %2314 = vmatmul.msk.bf16.vlgmr.msrb.gmra.mxu3 %vm1033_vm8, %v958_v39 }
 0x213   :  { %1157 = vmatmul.bf16.vlgmr.msrb.gmra.mxu0 %v957_v10  ;;  %2352 = vmatmul.msk.bf16.vlgmr.msrb.gmra.mxu1 %vm1033_vm8, %v958_v39  ;;  %v2684_v39 = vld [vmem:[#allocation11 + $0x98] sm:$0xff] }
 0x214   :  { %1533 = vmatpush.bf16.msrb.mxu2 %v1528_v13 }
 0x217   :  { %v935_v28 = vpop.f32.mrf.mxu2  ;;  %v953_v60 = vpop.f32.mrf.mxu3 }
 0x218   :  { %v959_v61 = vpack.c.bf16 %v935_v28, %v935_v28  ;;  %v960_v63 = vpack.c.bf16 %v953_v60, %v953_v60  ;;  %1534 = vmatpush.bf16.msrb.mxu2 %v2686_v4 }
 0x21c   :  { %1535 = vmatpush.bf16.msrb.mxu2 %v2685_v53 }
 0x21f   :  { %v937_v0 = vpop.f32.mrf.mxu2  ;;  %v955_v7 = vpop.f32.mrf.mxu3 }
 0x220   :  { %1536 = vmatpush.bf16.msrb.mxu2 %v2684_v39  ;;  %v2702_v39 = vld [vmem:[#allocation13 + $0x78] sm:$0xff] }
 0x221   :  { %1733 = vmatpush.bf16.msrb.mxu1 %v2702_v39  ;;  %v2712_v39 = vld [vmem:[#allocation14 + $0x48] sm:$0xff] }
 0x222   :  { %1053 = vmatmul.bf16.gmra.mxu2 %v959_v61  ;;  %2315 = vmatmul.msk.bf16.gmra.mxu3 %vm1033_vm8, %v960_v63 }
 0x223   :  { %1162 = vmatmul.bf16.gmra.mxu0 %v959_v61  ;;  %2353 = vmatmul.msk.bf16.gmra.mxu1 %vm1033_vm8, %v960_v63 }
 0x224   :  { %1537 = vmatpush.bf16.msrb.mxu2 %v2683_v15 }
 0x290   :  { %v1158_v52 = vpop.f32.mrf.mxu0  ;;  %v1176_v41 = vpop.f32.mrf.mxu1 }
 0x291   :  { %v1177_v57 = vadd.f32 %v1176_v41, %v1158_v52 }
 0x295   :  { %v1049_v55 = vpop.f32.mrf.mxu2  ;;  %v1067_v20 = vpop.f32.mrf.mxu3 }
 0x296   :  { %v1068_v14 = vadd.f32 %v1067_v20, %v1049_v55 }
 0x298   :  { %v1160_v42 = vpop.f32.mrf.mxu0  ;;  %v1178_v12 = vpop.f32.mrf.mxu1  ;;  %v3488_v62 = vmax.f32 %v1068_v14, %v1177_v57 }
 0x299   :  { %v1179_v58 = vadd.f32 %v1178_v12, %v1160_v42 }
 0x29a   :  { %v1199_v49 = vrot.slane %v3488_v62, 1  ;;  %v1326_v8 = vrot.slane %v3488_v62, 2  ;;  %v1401_v59 = vrot.slane %v3488_v62, 3  ;;  %v1476_v51 = vrot.slane %v3488_v62, 4 }
 0x29d   :  { %v1051_v19 = vpop.f32.mrf.mxu2  ;;  %v1069_v26 = vpop.f32.mrf.mxu3 }
 0x29e   :  { %v1070_v48 = vadd.f32 %v1069_v26, %v1051_v19 }
 0x2a0   :  { %v1186_v2 = vmax.f32 %v1070_v48, %v1179_v58  ;;  %v1163_v45 = vpop.f32.mrf.mxu0  ;;  %v1181_v46 = vpop.f32.mrf.mxu1 }
 0x2a1   :  { %v1182_v10 = vadd.f32 %v1181_v46, %v1163_v45 }
 0x2a2   :  { %v1188_v5 = vpack.c.bf16 %v1186_v2, %v3488_v62  ;;  %v1200_v28 = vrot.slane %v1186_v2, 1  ;;  %v1327_v60 = vrot.slane %v1186_v2, 2  ;;  %v1402_v61 = vrot.slane %v1186_v2, 3 }
 0x2a3   :  { %v1477_v50 = vrot.slane %v1186_v2, 4 }
 0x2a4   :  { %2388 = vmatmul.msk.bf16.vlgmr.msra.gmra.mxu3 %vm1244_vm9, %v1188_v5  ;;  %v1203_v17 = vsel %vm223_vm1, %v1199_v49, %v1200_v28  ;;  %v1330_v32 = vsel %vm433_vm3, %v1326_v8, %v1327_v60  ;;  %v1405_v31 = vsel %vm563_vm4, %v1401_v59, %v1402_v61 }
 0x2a5   :  { %v1054_v54 = vpop.f32.mrf.mxu2  ;;  %v1072_v11 = vpop.f32.mrf.mxu3  ;;  %v1480_v41 = vsel %vm693_vm5, %v1476_v51, %v1477_v50 }
 0x2a6   :  { %v1073_v38 = vadd.f32 %v1072_v11, %v1054_v54 }
 0x2a8   :  { %v1187_v63 = vmax.f32 %v1073_v38, %v1182_v10  ;;  %v1165_v0 = vpop.f32.mrf.mxu0  ;;  %v1183_v7 = vpop.f32.mrf.mxu1  ;;  %v2694_v10 = vld [vmem:[#allocation13 + $0x38] sm:$0xff] }
 0x2a9   :  { %1655 = vmatpush.bf16.msrb.mxu0 %v2694_v10  ;;  %v2713_v10 = vld [vmem:[#allocation14 + $0x50] sm:$0xff] }
 0x2aa   :  { %v1201_v6 = vrot.slane %v1187_v63, 1  ;;  %v1328_v29 = vrot.slane %v1187_v63, 2  ;;  %v1403_v9 = vrot.slane %v1187_v63, 3  ;;  %v1189_v22 = vpack.c.bf16 %v1187_v63, %v1187_v63 }
 0x2ab   :  { %v1478_v47 = vrot.slane %v1187_v63, 4  ;;  %v2701_v63 = vld [vmem:[#allocation13 + $0x70] sm:$0xff] }
 0x2ac   :  { %v1202_v33 = vsel %vm223_vm1, %v1200_v28, %v1201_v6  ;;  %v1329_v34 = vsel %vm433_vm3, %v1327_v60, %v1328_v29  ;;  %v1404_v40 = vsel %vm563_vm4, %v1402_v61, %v1403_v9  ;;  %v1204_v23 = vsel %vm223_vm1, %v1201_v6, %v1199_v49  ;;  %v2693_v61 = vld [vmem:[#allocation13 + $0x30] sm:$0xff]  ;;  %1734 = vmatpush.bf16.msrb.mxu1 %v2701_v63 }
 0x2ad   :  { %v1205_v18 = vpack.c.bf16 %v1202_v33, %v1203_v17  ;;  %v1332_v27 = vpack.c.bf16 %v1329_v34, %v1330_v32  ;;  %v1407_v36 = vpack.c.bf16 %v1404_v40, %v1405_v31  ;;  %v1056_v30 = vpop.f32.mrf.mxu2  ;;  %v1074_v37 = vpop.f32.mrf.mxu3  ;;  %v1331_v24 = vsel %vm433_vm3, %v1328_v29, %v1326_v8  ;;  %1656 = vmatpush.bf16.msrb.mxu0 %v2693_v61  ;;  %v2692_v29 = vld [vmem:[#allocation13 + $0x28] sm:$0xff]  ;;  %v2691_v34 = vld [vmem:[#allocation13 + $0x20] sm:$0xff] }
 0x2ae   :  { %v1406_v25 = vsel %vm563_vm4, %v1403_v9, %v1401_v59  ;;  %v1206_v3 = vpack.c.bf16 %v1204_v23, %v1204_v23  ;;  %v1333_v43 = vpack.c.bf16 %v1331_v24, %v1331_v24  ;;  %v1479_v52 = vsel %vm693_vm5, %v1477_v50, %v1478_v47  ;;  %v2700_v9 = vld [vmem:[#allocation13 + $0x68] sm:$0xff]  ;;  %v2699_v40 = vld [vmem:[#allocation13 + $0x60] sm:$0xff]  ;;  %v2690_v30 = vld [vmem:[#allocation13 + $0x18] sm:$0xff] }
 0x2af   :  { %2370 = vmatmul.msk.bf16.vlgmr.msra.gmra.mxu2 %vm1244_vm9, %v1205_v18  ;;  %2406 = vmatmul.msk.bf16.vlgmr.msra.gmra.mxu0 %vm1244_vm9, %v1332_v27  ;;  %v1408_v35 = vpack.c.bf16 %v1406_v25, %v1406_v25  ;;  %v1482_v44 = vpack.c.bf16 %v1479_v52, %v1480_v41  ;;  %v1481_v55 = vsel %vm693_vm5, %v1478_v47, %v1476_v51  ;;  %v1551_v59 = vperm.slane %v3380_v16, 1  ;;  %v2698_v37 = vld [vmem:[#allocation13 + $0x58] sm:$0xff] }
 0x2b0   :  { %2424 = vmatmul.msk.bf16.vlgmr.msra.gmra.mxu1 %vm1244_vm9, %v1407_v36  ;;  %v1483_v20 = vpack.c.bf16 %v1481_v55, %v1481_v55  ;;  %v2696_v55 = vld [vmem:[#allocation13 + $0x48] sm:$0xff] }
 0x2b1   :  { %1657 = vmatpush.bf16.msrb.mxu0 %v2692_v29  ;;  %1735 = vmatpush.bf16.msrb.mxu1 %v2700_v9 }
 0x2b4   :  { %2389 = vmatmul.msk.bf16.gmra.mxu3 %vm1244_vm9, %v1189_v22 }
 0x2b5   :  { %1658 = vmatpush.bf16.msrb.mxu0 %v2691_v34  ;;  %1736 = vmatpush.bf16.msrb.mxu1 %v2699_v40 }
 0x2b9   :  { %1659 = vmatpush.bf16.msrb.mxu0 %v2690_v30  ;;  %1737 = vmatpush.bf16.msrb.mxu1 %v2698_v37 }
 0x2bf   :  { %2371 = vmatmul.msk.bf16.gmra.mxu2 %vm1244_vm9, %v1206_v3  ;;  %2407 = vmatmul.msk.bf16.gmra.mxu0 %vm1244_vm9, %v1333_v43  ;;  %v2689_v43 = vld [vmem:[#allocation13 + $0x10] sm:$0xff] }
 0x2c0   :  { %2425 = vmatmul.msk.bf16.gmra.mxu1 %vm1244_vm9, %v1408_v35  ;;  %v2697_v35 = vld [vmem:[#allocation13 + $0x50] sm:$0xff]  ;;  %1660 = vmatpush.bf16.msrb.mxu0 %v2689_v43  ;;  %v1952_v43 = vperm.slane %v3380_v16, 2  ;;  %v2719_v16 = vld [vmem:[#allocation16] sm:$0xff] }
 0x2c1   :  { %1738 = vmatpush.bf16.msrb.mxu1 %v2697_v35  ;;  %v2722_v35 = vld [vmem:[#allocation16 + $0x18] sm:$0xff] }
 0x2c5   :  { %1739 = vmatpush.bf16.msrb.mxu1 %v2696_v55  ;;  %v2720_v55 = vld [vmem:[#allocation16 + $0x8] sm:$0xff] }
 0x2cf   :  { %2442 = vmatmul.msk.bf16.vlgmr.msrb.gmra.mxu2 %vm1244_vm9, %v1482_v44  ;;  %v2688_v44 = vld [vmem:[#allocation13 + $0x8] sm:$0xff] }
 0x2d0   :  { %1661 = vmatpush.bf16.msrb.mxu0 %v2688_v44 }
 0x2d4   :  { %1662 = vmatpush.bf16.msrb.mxu0 %v2687_v1 }
 0x2df   :  { %2443 = vmatmul.msk.bf16.gmra.mxu2 %vm1244_vm9, %v1483_v20 }
 0x327   :  { %v1317_v21 = vpop.f32.mrf.mxu3 }
 0x32c   :  { %v1389_v56 = vpop.f32.mrf.mxu0 }
 0x32d   :  { %v1464_v42 = vpop.f32.mrf.mxu1 }
 0x32f   :  { %v1319_v12 = vpop.f32.mrf.mxu3 }
 0x332   :  { %v1263_v13 = vpop.f32.mrf.mxu2 }
 0x333   :  { %v1318_v53 = vadd.f32 %v1317_v21, %v1263_v13  ;;  %v2695_v13 = vld [vmem:[#allocation13 + $0x40] sm:$0xff] }
 0x334   :  { %v1391_v14 = vpop.f32.mrf.mxu0  ;;  %1740 = vmatpush.bf16.msrb.mxu1 %v2695_v13  ;;  %v2730_v13 = vld [vmem:[#allocation17 + $0x20] sm:$0xff] }
 0x335   :  { %v1466_v19 = vpop.f32.mrf.mxu1  ;;  %v1398_v11 = vadd.f32 %v1389_v56, %v1318_v53  ;;  %v2703_v53 = vld [vmem:[#allocation14] sm:$0xff] }
 0x337   :  { %v1322_v26 = vpop.f32.mrf.mxu3  ;;  %v1473_v0 = vadd.f32 %v1464_v42, %v1398_v11  ;;  %v2715_v11 = vld [vmem:[#allocation14 + $0x60] sm:$0xff] }
 0x33a   :  { %v1265_v57 = vpop.f32.mrf.mxu2 }
 0x33b   :  { %v1320_v54 = vadd.f32 %v1319_v12, %v1265_v57  ;;  %v1558_v12 = vld [vmem:[%s3555_s6] sm:$0xf] }
 0x33c   :  { %v1394_v48 = vpop.f32.mrf.mxu0 }
 0x33d   :  { %v1469_v58 = vpop.f32.mrf.mxu1  ;;  %v1399_v38 = vadd.f32 %v1391_v14, %v1320_v54  ;;  %v2710_v14 = vld [vmem:[#allocation14 + $0x38] sm:$0xff]  ;;  %v2707_v54 = vld [vmem:[#allocation14 + $0x20] sm:$0xff] }
 0x33f   :  { %v1324_v62 = vpop.f32.mrf.mxu3  ;;  %v1474_v7 = vadd.f32 %v1466_v19, %v1399_v38  ;;  %v2709_v19 = vld [vmem:[#allocation14 + $0x30] sm:$0xff]  ;;  %v2714_v38 = vld [vmem:[#allocation14 + $0x58] sm:$0xff] }
 0x340   :  { %v2718_v62 = vld [vmem:[#allocation14 + $0x78] sm:$0xff] }
 0x341   :  { %1942 = vmatpush.bf16.msra.mxu0 %v2718_v62  ;;  %v2726_v62 = vld [vmem:[#allocation17] sm:$0xff] }
 0x342   :  { %v1268_v2 = vpop.f32.mrf.mxu2 }
 0x343   :  { %v1323_v28 = vadd.f32 %v1322_v26, %v1268_v2  ;;  %v2705_v2 = vld [vmem:[#allocation14 + $0x10] sm:$0xff] }
 0x344   :  { %v1396_v45 = vpop.f32.mrf.mxu0 }
 0x345   :  { %v1471_v46 = vpop.f32.mrf.mxu1  ;;  %v1400_v49 = vadd.f32 %v1394_v48, %v1323_v28  ;;  %v2717_v45 = vld [vmem:[#allocation14 + $0x70] sm:$0xff]  ;;  %v2711_v28 = vld [vmem:[#allocation14 + $0x40] sm:$0xff] }
 0x346   :  { %1943 = vmatpush.bf16.msra.mxu0 %v2717_v45  ;;  %v2704_v46 = vld [vmem:[#allocation14 + $0x8] sm:$0xff] }
 0x347   :  { %v1475_v17 = vadd.f32 %v1469_v58, %v1400_v49  ;;  %v2706_v58 = vld [vmem:[#allocation14 + $0x18] sm:$0xff] }
 0x348   :  { %1839 = vmatpush.bf16.msra.mxu2 %v2706_v58  ;;  %v2727_v58 = vld [vmem:[#allocation17 + $0x8] sm:$0xff] }
 0x34a   :  { %v1270_v4 = vpop.f32.mrf.mxu2 }
 0x34b   :  { %v2708_v4 = vld [vmem:[#allocation14 + $0x28] sm:$0xff] }
 0x34c   :  { %1840 = vmatpush.bf16.msra.mxu2 %v2705_v2  ;;  %v2746_v2 = vld [vmem:[#allocation7] sm:$0xff] }
 0x34d   :  { %v1993_v45 = vperm.slane %v2746_v2, 3 }
 0x350   :  { %1841 = vmatpush.bf16.msra.mxu2 %v2704_v46 }
 0x352   :  { %v1539_v5 = vpop.f32.mrf.mxu2 }
 0x353   :  { %v1548_v8 = vadd.f32 %v1539_v5, %v1473_v0  ;;  %v2716_v5 = vld [vmem:[#allocation14 + $0x68] sm:$0xff] }
 0x354   :  { %1944 = vmatpush.bf16.msra.mxu0 %v2716_v5  ;;  %1842 = vmatpush.bf16.msra.mxu2 %v2703_v53 }
 0x355   :  { %v1552_v15 = vadd.f32 %v1551_v59, %v1548_v8 }
 0x357   :  { %v1555_v18 = vmax.f32 %v1552_v15, 0.0 }
 0x358   :  { %1945 = vmatpush.bf16.msra.mxu0 %v2715_v11  ;;  %v2072_v11 = vperm.slane %v2746_v2, 4 }
 0x359   :  { %v1559_v23 = vrot.slane %v1555_v18, 1 }
 0x35a   :  { %v1541_v60 = vpop.f32.mrf.mxu2 }
 0x35b   :  { %v1549_v6 = vadd.f32 %v1541_v60, %v1474_v7 }
 0x35d   :  { %v1553_v32 = vadd.f32 %v1551_v59, %v1549_v6 }
 0x35f   :  { %v1556_v36 = vmax.f32 %v1553_v32, 0.0 }
 0x361   :  { %v1560_v25 = vrot.slane %v1556_v36, 1 }
 0x362   :  { %v1544_v33 = vpop.f32.mrf.mxu2 }
 0x363   :  { %v1550_v31 = vadd.f32 %v1544_v33, %v1475_v17  ;;  %v1563_v41 = vsel %vm223_vm1, %v1559_v23, %v1560_v25  ;;  %v1992_v33 = vld [vmem:[#allocation16 + $0x38] sm:$0xf] }
 0x364   :  { %v1565_v56 = vmax.f32 %v1555_v18, %v1563_v41  ;;  %v2023_v40 = vunpack.c.l.b16 %v1992_v33 }
 0x365   :  { %v1554_v27 = vadd.f32 %v1551_v59, %v1550_v31 }
 0x366   :  { %v2031_v18 = vpack.c.b16 %v2023_v40, %v2023_v40 }
 0x367   :  { %v1557_v22 = vmax.f32 %v1554_v27, 0.0 }
 0x368   :  { %v2044_v27 = vsel %vm914_vm6, %v2031_v18, 0 }
 0x369   :  { %v1561_v24 = vrot.slane %v1557_v22, 1  ;;  %2046 = vmatpush.bf16.msrb.mxu2 %v2044_v27 }
 0x36a   :  { %v1546_v3 = vpop.f32.mrf.mxu2 }
 0x36b   :  { %v1564_v47 = vsel %vm223_vm1, %v1561_v24, %v1559_v23  ;;  %v1562_v51 = vsel %vm223_vm1, %v1560_v25, %v1561_v24  ;;  %v2723_v23 = vld [vmem:[#allocation16 + $0x20] sm:$0xff] }
 0x36c   :  { %v1567_v50 = vmax.f32 %v1557_v22, %v1564_v47  ;;  %v1566_v20 = vmax.f32 %v1556_v36, %v1562_v51  ;;  %v2725_v36 = vld [vmem:[#allocation16 + $0x30] sm:$0xff]  ;;  %v2724_v22 = vld [vmem:[#allocation16 + $0x28] sm:$0xff] }
 0x36d   :  { %2047 = vmatpush.bf16.msrb.mxu2 %v2725_v36  ;;  %v2721_v51 = vld [vmem:[#allocation16 + $0x10] sm:$0xff] }
 0x36e   :  { %v1569_v52 = vpack.c.bf16 %v1567_v50, %v1567_v50  ;;  %v1568_v42 = vpack.c.bf16 %v1566_v20, %v1565_v56  ;;  %v2071_v56 = vld [vmem:[#allocation17 + $0x28] sm:$0x3] }
 0x370   :  { %v1575_v21 = vsel %vm914_vm6, %v1569_v52, 0 }
 0x371   :  { %1583 = vmatpush.bf16.msrb.mxu3 %v1575_v21  ;;  %2048 = vmatpush.bf16.msrb.mxu2 %v2724_v22  ;;  %v1955_v21 = vld [vmem:[%s3560_s11] sm:$0x1]  ;;  %s3039_s11 = smov [#allocation19]  }
 0x372   :  { %s2133_s8 = sshll.u32 %s3039_s11, 4  ;;  %s2134_s8 = int_to_ptr.vmem [resolvable:$true] %s2133_s8 }
 0x375   :  { %1584 = vmatpush.bf16.msrb.mxu3 %v1568_v42  ;;  %2049 = vmatpush.bf16.msrb.mxu2 %v2723_v23  ;;  %v2094_v42 = vunpack.c.l.b16 %v2071_v56 }
 0x378   :  { %2444 = vmatmul.msk.bf16.vlgmr.msrb.gmra.mxu3 %vm1570_vm10, %v1558_v12  ;;  %v2100_v12 = vpack.c.b16 %v2094_v42, %v2094_v42 }
 0x379   :  { %1799 = vmatpush.bf16.msra.mxu3 %v2710_v14  ;;  %2050 = vmatpush.bf16.msrb.mxu2 %v2722_v35  ;;  %v2729_v14 = vld [vmem:[#allocation17 + $0x18] sm:$0xff] }
 0x37a   :  { %v2112_v1 = vsel %vm2110_vm13, %v2100_v12, 0 }
 0x37d   :  { %1800 = vmatpush.bf16.msra.mxu3 %v2709_v19  ;;  %2051 = vmatpush.bf16.msrb.mxu2 %v2721_v51  ;;  %v2728_v19 = vld [vmem:[#allocation17 + $0x10] sm:$0xff] }
 0x381   :  { %1801 = vmatpush.bf16.msra.mxu3 %v2708_v4  ;;  %2052 = vmatpush.bf16.msrb.mxu2 %v2720_v55 }
 0x385   :  { %1802 = vmatpush.bf16.msra.mxu3 %v2707_v54  ;;  %2053 = vmatpush.bf16.msrb.mxu2 %v2719_v16 }
 0x389   :  { %1890 = vmatpush.bf16.msrb.mxu3 %v2714_v38 }
 0x38d   :  { %1891 = vmatpush.bf16.msrb.mxu3 %v2713_v10 }
 0x391   :  { %1892 = vmatpush.bf16.msrb.mxu3 %v2712_v39 }
 0x395   :  { %1893 = vmatpush.bf16.msrb.mxu3 %v2711_v28 }
 0x3fb   :  { %v1586_v26 = vpop.f32.mrf.mxu3 }
 0x3fc   :  { %v1590_v57 = vpack.c.bf16 %v1586_v26, %v1586_v26 }
 0x3fe   :  { %1663 = vmatmul.bf16.vlgmr.msrb.gmra.mxu0 %v1590_v57  ;;  %1741 = vmatmul.bf16.vlgmr.msrb.gmra.mxu1 %v1590_v57 }
 0x403   :  { %v1588_v48 = vpop.f32.mrf.mxu3 }
 0x47b   :  { %v1664_v60 = vpop.f32.mrf.mxu0  ;;  %v1742_v61 = vpop.f32.mrf.mxu1 }
 0x47c   :  { %v1746_v63 = vmax.f32 %v1664_v60, %v1742_v61 }
 0x47e   :  { %v1747_v0 = vpack.c.bf16 %v1746_v63, %v1746_v63  ;;  %v1756_v7 = vrot.slane %v1746_v63, 1  ;;  %v1900_v49 = vrot.slane %v1746_v63, 3  ;;  %v1848_v9 = vrot.slane %v1746_v63, 2 }
 0x480   :  { %v1757_v8 = vpack.c.bf16 %v1756_v7, %v1756_v7  ;;  %v1901_v59 = vpack.c.bf16 %v1900_v49, %v1900_v49  ;;  %2542 = vmatmul.msk.bf16.vlgmr.msra.gmra.mxu2 %vm1791_vm11, %v1747_v0  ;;  %v1849_v15 = vpack.c.bf16 %v1848_v9, %v1848_v9 }
 0x482   :  { %2525 = vmatmul.msk.bf16.vlgmr.msra.gmra.mxu3 %vm1791_vm11, %v1757_v8  ;;  %2576 = vmatmul.msk.bf16.vlgmr.msra.gmra.mxu0 %vm1791_vm11, %v1901_v59 }
 0x483   :  { %v1666_v6 = vpop.f32.mrf.mxu0  ;;  %v1744_v29 = vpop.f32.mrf.mxu1  ;;  %2116 = vmatpush.bf16.msra.mxu3 %v2112_v1 }
 0x487   :  { %2117 = vmatpush.bf16.msra.mxu3 %v2730_v13 }
 0x48b   :  { %2118 = vmatpush.bf16.msra.mxu3 %v2729_v14 }
 0x48f   :  { %2119 = vmatpush.bf16.msra.mxu3 %v2728_v19 }
 0x492   :  { %2559 = vmatmul.msk.bf16.vlgmr.msrb.gmra.mxu3 %vm1791_vm11, %v1849_v15 }
 0x493   :  { %2120 = vmatpush.bf16.msra.mxu3 %v2727_v58 }
 0x497   :  { %2121 = vmatpush.bf16.msra.mxu3 %v2726_v62 }
 0x4ff   :  { %v1947_v17 = vpop.f32.mrf.mxu0 }
 0x503   :  { %v1844_v32 = vpop.f32.mrf.mxu2 }
 0x505   :  { %v1804_v34 = vpop.f32.mrf.mxu3 }
 0x506   :  { %v1845_v24 = vadd.f32 %v1844_v32, %v1804_v34 }
 0x507   :  { %v1949_v31 = vpop.f32.mrf.mxu0 }
 0x50b   :  { %v1846_v30 = vpop.f32.mrf.mxu2 }
 0x50d   :  { %v1806_v37 = vpop.f32.mrf.mxu3 }
 0x515   :  { %v1895_v25 = vpop.f32.mrf.mxu3 }
 0x516   :  { %v1899_v3 = vadd.f32 %v1895_v25, %v1845_v24 }
 0x518   :  { %v1951_v47 = vadd.f32 %v1947_v17, %v1899_v3 }
 0x51a   :  { %v1953_v50 = vadd.f32 %v1952_v43, %v1951_v47 }
 0x51c   :  { %v1954_v52 = vmax.f32 %v1953_v50, 0.0 }
 0x51d   :  { %v1897_v41 = vpop.f32.mrf.mxu3 }
 0x51e   :  { %v1956_v44 = vpack.c.bf16 %v1954_v52, %v1954_v52 }
 0x520   :  { %v1962_v20 = vsel %vm914_vm6, %v1956_v44, 0 }
 0x521   :  { %1971 = vmatpush.bf16.msra.mxu1 %v1962_v20 }
 0x524   :  { %2577 = vmatmul.msk.bf16.vlgmr.msra.gmra.mxu1 %vm1957_vm12, %v1955_v21 }
 0x5a1   :  { %v1973_v26 = vpop.f32.mrf.mxu1 }
 0x5a2   :  { %v1977_v57 = vpack.c.bf16 %v1973_v26, %v1973_v26 }
 0x5a4   :  { %2606 = vmatmul.msk.bf16.vlgmr.msrb.gmra.mxu2 %vm2039_vm14, %v1977_v57 }
 0x5a9   :  { %v1975_v48 = vpop.f32.mrf.mxu1 }
 0x627   :  { %v2055_v46 = vpop.f32.mrf.mxu2 }
 0x628   :  { %v2056_v4 = vadd.f32 %v2055_v46, %v1993_v45 }
 0x62a   :  { %v2059_v5 = vmax.f32 %v2056_v4, 0.0 }
 0x62c   :  { %v2060_v53 = vpack.c.bf16 %v2059_v5, %v2059_v5 }
 0x62e   :  { %2627 = vmatmul.msk.bf16.vlgmr.msra.gmra.mxu3 %vm2106_vm15, %v2060_v53 }
 0x62f   :  { %v2057_v54 = vpop.f32.mrf.mxu2 }
 0x6b1   :  { %v2123_v38 = vpop.f32.mrf.mxu3 }
 0x6b2   :  { %v2124_v10 = vadd.f32 %v2123_v38, %v2072_v11 }
 0x6b4   :  { %2127 = vst [vmem:[#allocation19] sm:$0x3] %v2124_v10 }
 0x6b5   :  { %2138 = dma.vmem_to_hbm [thread:$0]  %s2134_s8, 32, %s2136_s16, [#allocation4]  }
 0x6b9   :  { %v2125_v39 = vpop.f32.mrf.mxu3 }
 0x6ba   :  { %3023 = dma.done.wait [#allocation4], 32  }
 0x6bb   :  { %3024 = vsyncadd [#allocation4], 4294967264 }
 0x6bc   :  { %2143 = vsyncpa [#allocation3], 1 }
 0x6bd   :  { %2144 = vsyncpa [#allocation6], 1 }
 0x6be   :  { %2145 = vsyncpa [#allocation9], 1 }
 0x6bf   :  { %2146 = vsyncpa [#allocation12], 1 }
 0x6c0   :  { %2147 = vsyncpa [#allocation15], 1 }
 0x6c1   :  { %2148 = vsyncpa [#allocation18], 1 }
 0x6c2   :  { %2149 = vsyncpa [#allocation4], 1 }

</bundles_post_ra>
